<compile_context>
chip_gen: v7x
topology: tpu7x:2x2x1
jax: 0.10.0
libtpu: 0.0.40
codegen_flags: <defaults>
</compile_context>

<pallas_src>
import functools

import jax
import jax.numpy as jnp
from jax import lax
from jax.experimental import pallas as pl
from jax.experimental.pallas import tpu as pltpu

# ---- static model dims -------------------------------------------------------
IN_CH = 4            # AtlasBNInception stem takes 4-channel images
CONV1_OUT = 64       # conv1_7x7_s2 output channels
CONV1_OUT_PAD = 128  # padded to a full lane width (zero weights/bias)
FEAT_CH = 1024       # BNInception final feature channels (input of the head)
NUM_CLASSES = 28
CLS_PAD = 128        # classifier output padded to a full lane width
K7, STRIDE, PAD = 7, 2, 3
K_IM2COL = K7 * K7 * IN_CH     # 196
K_IM2COL_PAD = 256             # lane-aligned contraction dim (zero padding)
BN_EPS = 1e-5

THW_DEFAULT = 1024             # spatial rows per tile (pipeline granule)


def _round_up(x, m):
    return ((x + m - 1) // m) * m


# ---- fused Pallas kernel ------------------------------------------------------
def _fused_kernel(patch_ref, w1_ref, b1_ref, w2_ref, b2_ref, wfc_ref, bfc_ref,
                  o_ref, acc_ref, *, hw_valid, thw, mask_rows):
    """For one (batch, hw-tile) grid point:
         conv1_7x7_s2 (im2col matmul, BN scale folded into w1) + bias + ReLU
         -> bf16 -> 1x1 trunk (scale folded into w2) + bias + ReLU
         -> accumulate global-average pool in VMEM scratch
         -> on the last hw tile: mean, Linear(1024, 28-padded-to-128).
       The hw grid axis is a reduction ("arbitrary"); the batch axis is
       "parallel" (on v7x with N >= 2 this feeds both TensorCores).
       TODO(synk): for N == 1 on v7x, split the hw reduction into two partial
       accumulators to use both TensorCores.
    """
    h = pl.program_id(1)
    last = pl.num_programs(1) - 1

    @pl.when(h == 0)
    def _init():
        acc_ref[...] = jnp.zeros_like(acc_ref)

    # conv1 7x7/s2 as an im2col matmul; only +bias remains (scale pre-folded).
    y = jnp.dot(patch_ref[0], w1_ref[...], preferred_element_type=jnp.float32)
    y = jnp.maximum(y + b1_ref[...], 0.0).astype(jnp.bfloat16)

    # 1x1 trunk projection (stand-in for BNInception trunk), scale pre-folded.
    z = jnp.dot(y, w2_ref[...], preferred_element_type=jnp.float32)
    z = jnp.maximum(z + b2_ref[...], 0.0)

    if mask_rows:
        # Only the last hw tile contains padded rows; pay for the mask there
        # only.  (Padded im2col rows yield ReLU(b1) != 0 and then ReLU(b2) != 0,
        # so post-activation masking is required for a correct mean.)
        @pl.when(h == last)
        def _acc_tail():
            row = lax.broadcasted_iota(jnp.int32, (thw, 1), 0) + h * thw
            acc_ref[...] += jnp.sum(jnp.where(row < hw_valid, z, 0.0),
                                    axis=0, keepdims=True)

        @pl.when(h != last)
        def _acc_body():
            acc_ref[...] += jnp.sum(z, axis=0, keepdims=True)
    else:
        acc_ref[...] += jnp.sum(z, axis=0, keepdims=True)

    @pl.when(h == last)
    def _finalize():
        pooled = acc_ref[...] * (1.0 / float(hw_valid))          # f32 mean
        logits = jnp.dot(pooled, wfc_ref[...],                    # f32 head
                         preferred_element_type=jnp.float32) + bfc_ref[...]
        o_ref[0] = logits


# ---- deterministic parameter construction ------------------------------------
def init_params(key):
    ks = jax.random.split(key, 10)
    # conv1_7x7_s2: pretrained weight is [64, 3, 7, 7]; AtlasBNInception
    # concatenates channel 0 again to build the 4-channel stem.
    w1_rgb = 0.05 * jax.random.normal(ks[0], (CONV1_OUT, 3, K7, K7), jnp.float32)
    w1 = jnp.concatenate([w1_rgb, w1_rgb[:, :1]], axis=1)            # [64, 4, 7, 7]
    bn1_gamma = 1.0 + 0.1 * jax.random.normal(ks[1], (CONV1_OUT,), jnp.float32)
    bn1_beta = 0.1 * jax.random.normal(ks[2], (CONV1_OUT,), jnp.float32)
    bn1_mean = 0.1 * jax.random.normal(ks[3], (CONV1_OUT,), jnp.float32)
    bn1_var = jnp.abs(1.0 + 0.1 * jax.random.normal(ks[4], (CONV1_OUT,), jnp.float32))

    # TODO(synk): real BNInception trunk not available; deterministic 1x1 stand-in.
    w2 = 0.05 * jax.random.normal(ks[5], (CONV1_OUT, FEAT_CH), jnp.float32)
    scale2 = 1.0 + 0.1 * jax.random.normal(ks[6], (FEAT_CH,), jnp.float32)
    bias2 = 0.1 * jax.random.normal(ks[7], (FEAT_CH,), jnp.float32)

    # Linear(1024, 28) head, PyTorch-style uniform init
    bound = 1.0 / jnp.sqrt(jnp.float32(FEAT_CH))
    w_fc = jax.random.uniform(ks[8], (NUM_CLASSES, FEAT_CH), jnp.float32, -bound, bound)
    b_fc = jax.random.uniform(ks[9], (NUM_CLASSES,), jnp.float32, -bound, bound)

    return dict(w1=w1, bn1_gamma=bn1_gamma, bn1_beta=bn1_beta, bn1_mean=bn1_mean,
                bn1_var=bn1_var, w2=w2, scale2=scale2, bias2=bias2,
                w_fc=w_fc, b_fc=b_fc)


# ---- forward (glue in JAX, hot path in one fused Pallas kernel) ---------------
def forward(params, x_nchw):
    # NHWC, cast to bf16 ONCE before padding/slicing so no f32 im2col exists.
    x = jnp.transpose(x_nchw, (0, 2, 3, 1)).astype(jnp.bfloat16)
    N, H, W, _ = x.shape
    Ho = (H + 2 * PAD - K7) // STRIDE + 1
    Wo = (W + 2 * PAD - K7) // STRIDE + 1
    HW = Ho * Wo
    thw = min(THW_DEFAULT, _round_up(HW, 16))   # multiple of 16 for bf16 tiles
    HW_pad = _round_up(HW, thw)
    n_hw_tiles = HW_pad // thw

    # im2col in bf16, feature order (kh, kw, cin); K-padding folded into the
    # concat so the only extra copy is the (small) HW-row pad.
    # TODO(synk): replace with an in-kernel 7x7/s2 tap reduction over haloed
    # row slabs to avoid the ~12x im2col expansion entirely.
    xp = jnp.pad(x, ((0, 0), (PAD, PAD), (PAD, PAD), (0, 0)))
    cols = [xp[:, kh:kh + STRIDE * Ho:STRIDE, kw:kw + STRIDE * Wo:STRIDE, :]
            for kh in range(K7) for kw in range(K7)]
    cols.append(jnp.zeros((N, Ho, Wo, K_IM2COL_PAD - K_IM2COL), jnp.bfloat16))
    patches = jnp.concatenate(cols, axis=-1).reshape(N, HW, K_IM2COL_PAD)
    if HW_pad != HW:
        patches = jnp.pad(patches, ((0, 0), (0, HW_pad - HW), (0, 0)))

    # Fold BN into conv1 and the trunk: scale goes into the weights, only the
    # bias stays in the kernel epilogue.  Zero-padded rows/cols keep semantics.
    s1 = params["bn1_gamma"] / jnp.sqrt(params["bn1_var"] + BN_EPS)
    b1 = params["bn1_beta"] - params["bn1_mean"] * s1
    w1_flat = jnp.transpose(params["w1"], (2, 3, 1, 0)).reshape(K_IM2COL, CONV1_OUT)
    w1_pad = (jnp.zeros((K_IM2COL_PAD, CONV1_OUT_PAD), jnp.float32)
              .at[:K_IM2COL, :CONV1_OUT].set(w1_flat * s1[None, :])).astype(jnp.bfloat16)
    b1_pad = jnp.zeros((1, CONV1_OUT_PAD), jnp.float32).at[:, :CONV1_OUT].set(b1[None])

    w2_pad = (jnp.zeros((CONV1_OUT_PAD, FEAT_CH), jnp.float32)
              .at[:CONV1_OUT].set(params["w2"] * params["scale2"][None, :])
              ).astype(jnp.bfloat16)
    b2_pad = params["bias2"][None]                                   # (1, 1024) f32

    # Classifier kept in f32 (negligible cost, avoids precision loss on pooled).
    wfc_pad = (jnp.zeros((FEAT_CH, CLS_PAD), jnp.float32)
               .at[:, :NUM_CLASSES].set(jnp.transpose(params["w_fc"])))
    bfc_pad = jnp.zeros((1, CLS_PAD), jnp.float32).at[:, :NUM_CLASSES].set(
        params["b_fc"][None])

    kernel = functools.partial(_fused_kernel, hw_valid=HW, thw=thw,
                               mask_rows=(HW_pad != HW))
    logits_pad = pl.pallas_call(
        kernel,
        out_shape=jax.ShapeDtypeStruct((N, 1, CLS_PAD), jnp.float32),
        grid=(N, n_hw_tiles),
        in_specs=[
            pl.BlockSpec((1, thw, K_IM2COL_PAD), lambda n, h: (n, h, 0)),
            pl.BlockSpec((K_IM2COL_PAD, CONV1_OUT_PAD), lambda n, h: (0, 0)),
            pl.BlockSpec((1, CONV1_OUT_PAD), lambda n, h: (0, 0)),
            pl.BlockSpec((CONV1_OUT_PAD, FEAT_CH), lambda n, h: (0, 0)),
            pl.BlockSpec((1, FEAT_CH), lambda n, h: (0, 0)),
            pl.BlockSpec((FEAT_CH, CLS_PAD), lambda n, h: (0, 0)),
            pl.BlockSpec((1, CLS_PAD), lambda n, h: (0, 0)),
        ],
        out_specs=pl.BlockSpec((1, 1, CLS_PAD), lambda n, h: (n, 0, 0)),
        scratch_shapes=[pltpu.VMEM((1, FEAT_CH), jnp.float32)],
        compiler_params=pltpu.CompilerParams(
            dimension_semantics=("parallel", "arbitrary")),
    )(patches, w1_pad, b1_pad, w2_pad, b2_pad, wfc_pad, bfc_pad)

    # Dropout(0.5) is identity at inference; strip the class padding.
    return logits_pad[:, 0, :NUM_CLASSES]


# ---- pure-JAX reference for a sanity check ------------------------------------
def reference(params, x_nchw):
    x = x_nchw.astype(jnp.float32)
    y = lax.conv_general_dilated(
        x, params["w1"], (STRIDE, STRIDE), ((PAD, PAD), (PAD, PAD)),
        dimension_numbers=("NCHW", "OIHW", "NCHW"),
        precision=lax.Precision.HIGHEST)
    s1 = params["bn1_gamma"] / jnp.sqrt(params["bn1_var"] + BN_EPS)
    b1 = params["bn1_beta"] - params["bn1_mean"] * s1
    y = jnp.maximum(y * s1[None, :, None, None] + b1[None, :, None, None], 0.0)
    y = jnp.einsum("nchw,cd->ndhw", y, params["w2"], precision=lax.Precision.HIGHEST)
    y = jnp.maximum(y * params["scale2"][None, :, None, None]
                    + params["bias2"][None, :, None, None], 0.0)
    pooled = jnp.mean(y, axis=(2, 3))
    return jnp.dot(pooled, params["w_fc"].T,
                   precision=lax.Precision.HIGHEST) + params["b_fc"]


if __name__ == "__main__":
    key = jax.random.PRNGKey(0)
    k_param, k_x = jax.random.split(key)
    params = init_params(k_param)
    x = jax.random.normal(k_x, (2, IN_CH, 16, 16), jnp.float32)      # NCHW, small

    out = jax.jit(forward)(params, x)
    out = jax.block_until_ready(out)
    assert out.shape == (2, NUM_CLASSES)

    ref = jax.block_until_ready(reference(params, x))
    assert jnp.allclose(out, ref, atol=2e-2, rtol=2e-2), "mismatch vs pure-JAX reference"

    print("KERNEL_OK")
</pallas_src>

<mosaic_0001>
module attributes {stable_mosaic.version = 11 : i64} {
  func.func @_fused_kernel(%arg0: i32, %arg1: i32, %arg2: memref<1x64x256xbf16, #tpu.memory_space<vmem>>, %arg3: memref<256x128xbf16, #tpu.memory_space<vmem>>, %arg4: memref<1x128xf32, #tpu.memory_space<vmem>>, %arg5: memref<128x1024xbf16, #tpu.memory_space<vmem>>, %arg6: memref<1x1024xf32, #tpu.memory_space<vmem>>, %arg7: memref<1024x128xf32, #tpu.memory_space<vmem>>, %arg8: memref<1x128xf32, #tpu.memory_space<vmem>>, %arg9: memref<1x1x128xf32, #tpu.memory_space<vmem>>, %arg10: memref<1x1024xf32, #tpu.memory_space<vmem>>) attributes {dimension_semantics = [#tpu.dimension_semantics<parallel>, #tpu.dimension_semantics<arbitrary>], iteration_bounds = array<i64: 2, 1>, scalar_prefetch = 0 : i64, scratch_operands = 1 : i64, tpu.core_type = #tpu.core_type<tc>, window_params = [{transform_indices = @transform_0, window_bounds = array<i64: 1, 64, 256>}, {pipeline_mode = #tpu.pipeline_mode<synchronous>, transform_indices = @transform_1, window_bounds = array<i64: 256, 128>}, {pipeline_mode = #tpu.pipeline_mode<synchronous>, transform_indices = @transform_2, window_bounds = array<i64: 1, 128>}, {pipeline_mode = #tpu.pipeline_mode<synchronous>, transform_indices = @transform_3, window_bounds = array<i64: 128, 1024>}, {pipeline_mode = #tpu.pipeline_mode<synchronous>, transform_indices = @transform_4, window_bounds = array<i64: 1, 1024>}, {pipeline_mode = #tpu.pipeline_mode<synchronous>, transform_indices = @transform_5, window_bounds = array<i64: 1024, 128>}, {pipeline_mode = #tpu.pipeline_mode<synchronous>, transform_indices = @transform_6, window_bounds = array<i64: 1, 128>}, {transform_indices = @transform_7, window_bounds = array<i64: 1, 1, 128>}]} {
    %c0_i32 = arith.constant 0 : i32
    %0 = arith.cmpi eq, %arg1, %c0_i32 : i32
    %1 = arith.extui %0 : i1 to i32
    %c0_i32_0 = arith.constant 0 : i32
    %2 = arith.cmpi ne, %1, %c0_i32_0 : i32
    scf.if %2 {
      %cst_21 = arith.constant 0.000000e+00 : f32
      %28 = vector.broadcast %cst_21 : f32 to vector<1x1024xf32>
      %c0_22 = arith.constant 0 : index
      %c0_23 = arith.constant 0 : index
      %29 = vector.load %arg10[%c0_22, %c0_23] : memref<1x1024xf32, #tpu.memory_space<vmem>>, vector<1x1024xf32>
      tpu.vector_store %arg10[%c0_22, %c0_23], %28 {strides = array<i32>} : memref<1x1024xf32, #tpu.memory_space<vmem>>, vector<1x1024xf32>,
    } else {
    }
    %c0 = arith.constant 0 : index
    %c0_1 = arith.constant 0 : index
    %c0_2 = arith.constant 0 : index
    %3 = vector.load %arg2[%c0, %c0_1, %c0_2] : memref<1x64x256xbf16, #tpu.memory_space<vmem>>, vector<1x64x256xbf16>
    %4 = vector.shape_cast %3 : vector<1x64x256xbf16> to vector<64x256xbf16>
    %c0_3 = arith.constant 0 : index
    %c0_4 = arith.constant 0 : index
    %5 = vector.load %arg3[%c0_3, %c0_4] : memref<256x128xbf16, #tpu.memory_space<vmem>>, vector<256x128xbf16>
    %cst = arith.constant dense<0.000000e+00> : vector<64x128xf32>
    %6 = tpu.matmul %4, %5, %cst {dimension_numbers = #tpu.dot_dimension_numbers<[1], [0], [0], [1], [0, 0, 1, 1], [], []>} : vector<64x256xbf16>, vector<256x128xbf16>, vector<64x128xf32> -> vector<64x128xf32>
    %c0_5 = arith.constant 0 : index
    %c0_6 = arith.constant 0 : index
    %7 = vector.load %arg4[%c0_5, %c0_6] : memref<1x128xf32, #tpu.memory_space<vmem>>, vector<1x128xf32>
    %8 = vector.broadcast %7 : vector<1x128xf32> to vector<64x128xf32>
    %9 = arith.addf %6, %8 : vector<64x128xf32>
    %cst_7 = arith.constant 0.000000e+00 : f32
    %10 = vector.broadcast %cst_7 : f32 to vector<64x128xf32>
    %11 = arith.maximumf %9, %10 : vector<64x128xf32>
    %12 = arith.truncf %11 : vector<64x128xf32> to vector<64x128xbf16>
    %c0_8 = arith.constant 0 : index
    %c0_9 = arith.constant 0 : index
    %13 = vector.load %arg5[%c0_8, %c0_9] : memref<128x1024xbf16, #tpu.memory_space<vmem>>, vector<128x1024xbf16>
    %cst_10 = arith.constant dense<0.000000e+00> : vector<64x1024xf32>
    %14 = tpu.matmul %12, %13, %cst_10 {dimension_numbers = #tpu.dot_dimension_numbers<[1], [0], [0], [1], [0, 0, 1, 1], [], []>} : vector<64x128xbf16>, vector<128x1024xbf16>, vector<64x1024xf32> -> vector<64x1024xf32>
    %c0_11 = arith.constant 0 : index
    %c0_12 = arith.constant 0 : index
    %15 = vector.load %arg6[%c0_11, %c0_12] : memref<1x1024xf32, #tpu.memory_space<vmem>>, vector<1x1024xf32>
    %16 = vector.broadcast %15 : vector<1x1024xf32> to vector<64x1024xf32>
    %17 = arith.addf %14, %16 : vector<64x1024xf32>
    %cst_13 = arith.constant 0.000000e+00 : f32
    %18 = vector.broadcast %cst_13 : f32 to vector<64x1024xf32>
    %19 = arith.maximumf %17, %18 : vector<64x1024xf32>
    %c0_14 = arith.constant 0 : index
    %c0_15 = arith.constant 0 : index
    %20 = vector.load %arg10[%c0_14, %c0_15] : memref<1x1024xf32, #tpu.memory_space<vmem>>, vector<1x1024xf32>
    %cst_16 = arith.constant dense<0.000000e+00> : vector<1024xf32>
    %21 = vector.multi_reduction <add>, %19, %cst_16 [0] : vector<64x1024xf32> to vector<1024xf32>
    %22 = vector.shape_cast %21 : vector<1024xf32> to vector<1x1024xf32>
    %23 = arith.addf %20, %22 : vector<1x1024xf32>
    %c0_17 = arith.constant 0 : index
    %c0_18 = arith.constant 0 : index
    %24 = vector.load %arg10[%c0_17, %c0_18] : memref<1x1024xf32, #tpu.memory_space<vmem>>, vector<1x1024xf32>
    tpu.vector_store %arg10[%c0_17, %c0_18], %23 {strides = array<i32>} : memref<1x1024xf32, #tpu.memory_space<vmem>>, vector<1x1024xf32>,
    %c0_i32_19 = arith.constant 0 : i32
    %25 = arith.cmpi eq, %arg1, %c0_i32_19 : i32
    %26 = arith.extui %25 : i1 to i32
    %c0_i32_20 = arith.constant 0 : i32
    %27 = arith.cmpi ne, %26, %c0_i32_20 : i32
    scf.if %27 {
      %c0_21 = arith.constant 0 : index
      %c0_22 = arith.constant 0 : index
      %28 = vector.load %arg10[%c0_21, %c0_22] : memref<1x1024xf32, #tpu.memory_space<vmem>>, vector<1x1024xf32>
      %cst_23 = arith.constant 1.562500e-02 : f32
      %29 = vector.broadcast %cst_23 : f32 to vector<1x1024xf32>
      %30 = arith.mulf %28, %29 : vector<1x1024xf32>
      %c0_24 = arith.constant 0 : index
      %c0_25 = arith.constant 0 : index
      %31 = vector.load %arg7[%c0_24, %c0_25] : memref<1024x128xf32, #tpu.memory_space<vmem>>, vector<1024x128xf32>
      %cst_26 = arith.constant dense<0.000000e+00> : vector<1x128xf32>
      %32 = tpu.matmul %30, %31, %cst_26 {dimension_numbers = #tpu.dot_dimension_numbers<[1], [0], [0], [1], [0, 0, 1, 1], [], []>} : vector<1x1024xf32>, vector<1024x128xf32>, vector<1x128xf32> -> vector<1x128xf32>
      %c0_27 = arith.constant 0 : index
      %c0_28 = arith.constant 0 : index
      %33 = vector.load %arg8[%c0_27, %c0_28] : memref<1x128xf32, #tpu.memory_space<vmem>>, vector<1x128xf32>
      %34 = arith.addf %32, %33 : vector<1x128xf32>
      %c0_29 = arith.constant 0 : index
      %c0_30 = arith.constant 0 : index
      %c0_31 = arith.constant 0 : index
      %35 = vector.load %arg9[%c0_29, %c0_30, %c0_31] : memref<1x1x128xf32, #tpu.memory_space<vmem>>, vector<1x1x128xf32>
      %36 = vector.shape_cast %35 : vector<1x1x128xf32> to vector<1x128xf32>
      %37 = vector.shape_cast %34 : vector<1x128xf32> to vector<1x1x128xf32>
      tpu.vector_store %arg9[%c0_29, %c0_30, %c0_31], %37 {strides = array<i32>} : memref<1x1x128xf32, #tpu.memory_space<vmem>>, vector<1x1x128xf32>,
    } else {
    }
    return
  }
  func.func @transform_0(%arg0: i32, %arg1: i32) -> (i32, i32, i32) {
    %c0_i32 = arith.constant 0 : i32
    %c0_i32_0 = arith.constant 0 : i32
    return %arg0, %arg1, %c0_i32 : i32, i32, i32
  }
  func.func @transform_1(%arg0: i32, %arg1: i32) -> (i32, i32) {
    %c0_i32 = arith.constant 0 : i32
    %c0_i32_0 = arith.constant 0 : i32
    %c0_i32_1 = arith.constant 0 : i32
    return %c0_i32, %c0_i32_0 : i32, i32
  }
  func.func @transform_2(%arg0: i32, %arg1: i32) -> (i32, i32) {
    %c0_i32 = arith.constant 0 : i32
    %c0_i32_0 = arith.constant 0 : i32
    %c0_i32_1 = arith.constant 0 : i32
    return %c0_i32, %c0_i32_0 : i32, i32
  }
  func.func @transform_3(%arg0: i32, %arg1: i32) -> (i32, i32) {
    %c0_i32 = arith.constant 0 : i32
    %c0_i32_0 = arith.constant 0 : i32
    %c0_i32_1 = arith.constant 0 : i32
    return %c0_i32, %c0_i32_0 : i32, i32
  }
  func.func @transform_4(%arg0: i32, %arg1: i32) -> (i32, i32) {
    %c0_i32 = arith.constant 0 : i32
    %c0_i32_0 = arith.constant 0 : i32
    %c0_i32_1 = arith.constant 0 : i32
    return %c0_i32, %c0_i32_0 : i32, i32
  }
  func.func @transform_5(%arg0: i32, %arg1: i32) -> (i32, i32) {
    %c0_i32 = arith.constant 0 : i32
    %c0_i32_0 = arith.constant 0 : i32
    %c0_i32_1 = arith.constant 0 : i32
    return %c0_i32, %c0_i32_0 : i32, i32
  }
  func.func @transform_6(%arg0: i32, %arg1: i32) -> (i32, i32) {
    %c0_i32 = arith.constant 0 : i32
    %c0_i32_0 = arith.constant 0 : i32
    %c0_i32_1 = arith.constant 0 : i32
    return %c0_i32, %c0_i32_0 : i32, i32
  }
  func.func @transform_7(%arg0: i32, %arg1: i32) -> (i32, i32, i32) {
    %c0_i32 = arith.constant 0 : i32
    %c0_i32_0 = arith.constant 0 : i32
    %c0_i32_1 = arith.constant 0 : i32
    return %arg0, %c0_i32, %c0_i32_0 : i32, i32, i32
  }
}

</mosaic_0001>

<bundles_post_ra>
// kernel: forward.1
= control target key start
LH: loop header
LB: loop body
LE: loop exit
PB: predicated region body
PF: predicated region fallthrough
CT: control target
= control target key end

     0   :  { %12 = vsyncpa [#allocation4], 0  ;;  %s3630_s0 = inlined_call_operand.vmem [shape: bf16[2,64,256], index: 0, kind: input, shape index: {}]   ;;  %s3631_s1 = inlined_call_operand.vmem [shape: bf16[256,128], index: 1, kind: input, shape index: {}]   ;;  %s3632_s2 = inlined_call_operand.vmem [shape: f32[1,128], index: 2, kind: input, shape index: {}]   ;;  %s3633_s3 = inlined_call_operand.vmem [shape: bf16[128,1024], index: 3, kind: input, shape index: {}]   ;;  %s3634_s4 = inlined_call_operand.vmem [shape: f32[1,1024], index: 4, kind: input, shape index: {}]   ;;  %s3635_s5 = inlined_call_operand.vmem [shape: f32[1024,128], index: 5, kind: input, shape index: {}]   ;;  %s3636_s6 = inlined_call_operand.vmem [shape: f32[1,128], index: 6, kind: input, shape index: {}]   ;;  %s3637_s7 = inlined_call_operand.hbm [shape: f32[2,1,128], index: 7, kind: output, shape index: {}]  }
   0x1   :  { %14 = vsyncpa [#allocation4 + $0x1], 0  ;;  %s2677_s24 = smov 0   ;;  %s2679_s25 = smov 0  }
   0x2   :  { %s2681_s26 = smov 0   ;;  %s2683_s27 = smov 0  }
   0x3   :  { %s2685_s28 = smov 0   ;;  %s2687_s29 = smov 0  }
   0x4 LB: > { %s2061_s30 = sadd.s32 4294967295, %s2632_s29   ;;  %s2062_s8 = sadd.s32 4294967294, %s2632_s29   ;;  %s2632_s29 = sphi %s2687_s29, %s20_s29   ;;  %s2628_s28 = sphi %s2685_s28, %s3644_s28   ;;  %s2624_s27 = sphi %s2683_s27, %s3643_s27   ;;  %s2620_s26 = sphi %s2681_s26, %s3642_s26   ;;  %s2616_s25 = sphi %s2679_s25, %s3641_s25   ;;  %s2612_s24 = sphi %s2677_s24, %s3640_s24  }
   0x5   : > { %s32_s9 = sadd.s32 1, %s2628_s28  ;;  %s193_s10 = sadd.s32 1, %s2620_s26 }
   0x6   : > { %p34_p0 = scmp.ge.s32.totalorder %s32_s9, 2  ;;  %p203_p1 = scmp.ne.s32.totalorder %s2620_s26, %s2616_s25 }
   0x7   : > { %p204_p2 = scmp.eq.s32.totalorder %s2061_s30, 1  ;;  %p209_p3 = scmp.ne.s32.totalorder %s2616_s25, %s2612_s24 }
   0x8   : > { %s3646_s9 = smov (%p34_p0, %s32_s9), 0  ;;  %p210_p5 = scmp.eq.s32.totalorder %s2062_s8, 1 }
   0x9   : > { %p2717_p4 = por %p204_p2, %p203_p1  ;;  %s190_s12 = ssub.s32 %s2628_s28, %s3646_s9 }
   0xa   : > { %p2065_p6 = scmp.ge.s32.totalorder %s2632_s29, 1  ;;  %p191_p7 = scmp.eq.s32.totalorder %s190_s12, 0 }
   0xb   : > { %p2724_p8 = por %p210_p5, %p209_p3  ;;  %p260_p9 = scmp.lt.s32.totalorder %s2632_s29, 3 }
   0xc   : > { %s2730_s14 = scalar_select %p191_p7, %s2620_s26, %s193_s10  }
   0xd   : > { %p261_p10 = pnand %p2065_p6, %p260_p9 }
   0xe   : > { %v2526_v0 = vld [vmem:[%s3631_s1 + $0x40] sm:$0xff] (!%p261_p10)   ;;  %v2528_v2 = vld [vmem:[%s3631_s1 + $0x48] sm:$0xff] (!%p261_p10)   ;;  %p297_p11 = scmp.lt.s32.totalorder (!%p261_p10), %s2624_s27, 1  ;;  %v2530_v4 = vld [vmem:[%s3631_s1 + $0x50] sm:$0xff] (!%p261_p10)   ;;  %s294_s18 = sand.u32 (!%p261_p10), 1, %s2616_s25  }
   0xf   : > { %264 = sbr.rel (%p261_p10) target bundleno = 839 (0x347), region = 48  ;;  %v2527_v1 = vld [vmem:[%s3631_s1] sm:$0xff] (!%p261_p10)   ;;  %2161 = vmatprep.subr.bf16.mxu0 (!%p261_p10), %v2526_v0  ;;  %v2529_v3 = vld [vmem:[%s3631_s1 + $0x8] sm:$0xff] (!%p261_p10)   ;;  %v2531_v5 = vld [vmem:[%s3631_s1 + $0x10] sm:$0xff] (!%p261_p10)   ;;  %s295_s20 = scalar_lea.vmem (!%p261_p10), [#allocation3], %s294_s18 }
  0x10   : > { %2162 = vmatpush3.bf16.msra.mxu0 (!%p261_p10), %v2527_v1  ;;  %v2532_v6 = vld [vmem:[%s3631_s1 + $0x58] sm:$0xff] (!%p261_p10)   ;;  %v2534_v8 = vld [vmem:[%s3631_s1 + $0x60] sm:$0xff] (!%p261_p10)   ;;  %v2536_v10 = vld [vmem:[%s3631_s1 + $0x68] sm:$0xff] (!%p261_p10)   ;;  %s1989_s21 = sshll.u32 (!%p261_p10), %s295_s20, 4  ;;  %s1977_s8 = scalar_lea.sflag (!%p261_p10), [#allocation4], %s294_s18  ;;  %s3585_s21 = int_to_ptr.vmem [resolvable:$true] %s1989_s21 }
  0x11   : > { %2163 = vmatprep.subr.bf16.mxu0 (!%p261_p10), %v2528_v2  ;;  %v2533_v7 = vld [vmem:[%s3631_s1 + $0x18] sm:$0xff] (!%p261_p10)   ;;  %v2535_v9 = vld [vmem:[%s3631_s1 + $0x20] sm:$0xff] (!%p261_p10)   ;;  %v2537_v12 = vld [vmem:[%s3631_s1 + $0x28] sm:$0xff] (!%p261_p10)   ;;  %s2554_s10 = scalar_lea.vmem (!%p261_p10), %s3585_s21, 16 }
  0x12   : > { %v2538_v13 = vld [vmem:[%s3631_s1 + $0x70] sm:$0xff] (!%p261_p10)   ;;  %v573_v14 = vld [vmem:[%s3633_s3] sm:$0xff] (!%p261_p10)  ;;  %v2540_v21 = vld [vmem:[%s3631_s1 + $0x78] sm:$0xff] (!%p261_p10)   ;;  %p2555_p12 = scmp.ne.s32.totalorder (!%p261_p10), %s3585_s21, %s2554_s10 }
  0x13   : > { %v577_v15 = vld [vmem:[%s3633_s3 + $0x20] sm:$0xff] (!%p261_p10)  ;;  %v2539_v19 = vld [vmem:[%s3631_s1 + $0x30] sm:$0xff] (!%p261_p10)   ;;  %v574_v25 = vld [vmem:[%s3633_s3 + $0x8] sm:$0xff] (!%p261_p10) }
  0x14   : > { %2164 = vmatpush3.bf16.msra.mxu0 (!%p261_p10), %v2529_v3  ;;  %v2094_v16 = vcombine.high (!%p261_p10), %v573_v14, %v577_v15  ;;  %v2093_v17 = vcombine.low (!%p261_p10), %v573_v14, %v577_v15  ;;  %v581_v18 = vld [vmem:[%s3633_s3 + $0x40] sm:$0xff] (!%p261_p10)  ;;  %v578_v26 = vld [vmem:[%s3633_s3 + $0x28] sm:$0xff] (!%p261_p10)  ;;  %v2541_v29 = vld [vmem:[%s3631_s1 + $0x38] sm:$0xff] (!%p261_p10)   ;;  %p2556_p13 = pnand (!%p261_p10), %p2555_p12, %p2717_p4 }
  0x15   : > { %2165 = vmatprep.subr.bf16.mxu0 (!%p261_p10), %v2530_v4  ;;  %v585_v20 = vld [vmem:[%s3633_s3 + $0x60] sm:$0xff] (!%p261_p10)  ;;  %v2096_v32 = vcombine.high (!%p261_p10), %v574_v25, %v578_v26  ;;  %v582_v33 = vld [vmem:[%s3633_s3 + $0x48] sm:$0xff] (!%p261_p10)  ;;  %v2095_v39 = vcombine.low (!%p261_p10), %v574_v25, %v578_v26  ;;  %v579_v25 = vld [vmem:[%s3633_s3 + $0x30] sm:$0xff] (!%p261_p10) }
  0x16   : > { %s298_s12 = scalar_select %p297_p11, %s2624_s27, 1  ;;  %999 = vmatprep.subr.bf16.mxu1 %v2094_v16  ;;  %v2102_v22 = vcombine.high %v581_v18, %v585_v20  ;;  %v589_v23 = vld [vmem:[%s3633_s3 + $0x80] sm:$0xff]  ;;  %v2101_v27 = vcombine.low %v581_v18, %v585_v20  ;;  %v586_v34 = vld [vmem:[%s3633_s3 + $0x68] sm:$0xff]  ;;  %v576_v26 = vld [vmem:[%s3633_s3 + $0x18] sm:$0xff] }
  0x17   : > { %v593_v24 = vld [vmem:[%s3633_s3 + $0xa0] sm:$0xff]  ;;  %1000 = vmatpush1.bf16.msra.mxu1 %v2093_v17  ;;  %v2104_v42 = vcombine.high %v582_v33, %v586_v34  ;;  %v590_v43 = vld [vmem:[%s3633_s3 + $0x88] sm:$0xff]  ;;  %v2103_v47 = vcombine.low %v582_v33, %v586_v34  ;;  %p2557_p0 = pneg %p2556_p13 }
  0x18   : > { %2166 = vmatpush3.bf16.msra.mxu0 %v2531_v5  ;;  %s2160_s19 = sshll.u32 %s298_s12, 6  ;;  %1001 = vmatprep.subr.bf16.mxu1 %v2102_v22  ;;  %v2110_v28 = vcombine.high %v589_v23, %v593_v24  ;;  %v597_v30 = vld [vmem:[%s3633_s3 + $0xc0] sm:$0xff]  ;;  %v2109_v35 = vcombine.low %v589_v23, %v593_v24  ;;  %v594_v44 = vld [vmem:[%s3633_s3 + $0xa8] sm:$0xff]  ;;  %v575_v24 = vld [vmem:[%s3633_s3 + $0x10] sm:$0xff] }
  0x19   : > { %2167 = vmatprep.subr.bf16.mxu0 %v2532_v6  ;;  %s2764_s30 = scalar_lea.vmem %s3630_s0, %s2160_s19  ;;  %v601_v31 = vld [vmem:[%s3633_s3 + $0xe0] sm:$0xff]  ;;  %v2112_v50 = vcombine.high %v590_v43, %v594_v44  ;;  %v598_v51 = vld [vmem:[%s3633_s3 + $0xc8] sm:$0xff]  ;;  %v2111_v57 = vcombine.low %v590_v43, %v594_v44  ;;  %v587_v43 = vld [vmem:[%s3633_s3 + $0x70] sm:$0xff]  ;;  %s2157_s19 = sshll.u32 %s2624_s27, 4 }
  0x1a   : > { %v2544_v11 = vld [vmem:[%s2764_s30 + $0x4] ss:$8 sps:$4 sm:$0xff]   ;;  %v2542_v36 = vld [vmem:[%s2764_s30] ss:$8 sps:$4 sm:$0xff]   ;;  %v2118_v37 = vcombine.high %v597_v30, %v601_v31  ;;  %v2545_v38 = vld [vmem:[%s2764_s30 + $0x14] ss:$8 sps:$4 sm:$0xff]   ;;  %v2117_v45 = vcombine.low %v597_v30, %v601_v31  ;;  %v2097_v30 = vcombine.low %v575_v24, %v579_v25  ;;  %s3583_s23 = scalar_lea.hbm %s3637_s7, %s2157_s19 }
  0x1b   : > { %528 = vmatprep.mubr.bf16.mxu0 %v2544_v11  ;;  %1002 = vmatpush1.bf16.msra.mxu1 %v2101_v27  ;;  %v605_v40 = vld [vmem:[%s3633_s3 + $0x100] sm:$0xff]  ;;  %v602_v52 = vld [vmem:[%s3633_s3 + $0xe8] sm:$0xff]  ;;  %v2547_v54 = vld [vmem:[%s2764_s30 + $0x10] ss:$8 sps:$4 sm:$0xff]   ;;  %v2098_v27 = vcombine.high %v575_v24, %v579_v25  ;;  %s2636_s27 = smov [#allocation3]  }
  0x1c   : > { %2168 = vmatpush3.bf16.msra.mxu0 %v2533_v7  ;;  %1003 = vmatprep.subr.bf16.mxu1 %v2110_v28  ;;  %v609_v41 = vld [vmem:[%s3633_s3 + $0x120] sm:$0xff]  ;;  %v2120_v58 = vcombine.high %v598_v51, %v602_v52  ;;  %v606_v59 = vld [vmem:[%s3633_s3 + $0x108] sm:$0xff]  ;;  %v2119_v61 = vcombine.low %v598_v51, %v602_v52  ;;  %v2551_v2 = vld [vmem:[%s2764_s30 + $0x34] ss:$8 sps:$4 sm:$0xff]   ;;  %s2558_s15 = sshll.u32 %s2636_s27, 4  ;;  %s2559_s15 = int_to_ptr.vmem [resolvable:$false] %s2558_s15 }
  0x1d   : > { %2169 = vmatprep.subr.bf16.mxu0 %v2534_v8  ;;  %v2126_v46 = vcombine.high %v605_v40, %v609_v41  ;;  %v613_v48 = vld [vmem:[%s3633_s3 + $0x140] sm:$0xff]  ;;  %v2125_v53 = vcombine.low %v605_v40, %v609_v41  ;;  %v610_v60 = vld [vmem:[%s3633_s3 + $0x128] sm:$0xff]  ;;  %v2553_v6 = vld [vmem:[%s2764_s30 + $0x30] ss:$8 sps:$4 sm:$0xff]   ;;  %s2560_s16 = scalar_lea.vmem %s2559_s15, 32  ;;  %p2561_p1 = scmp.lt.s32.totalorder %s3585_s21, %s2559_s15 }
  0x1e   : > { %v617_v49 = vld [vmem:[%s3633_s3 + $0x160] sm:$0xff]  ;;  %v2128_v62 = vcombine.high %v606_v59, %v610_v60  ;;  %v614_v63 = vld [vmem:[%s3633_s3 + $0x148] sm:$0xff]  ;;  %v2127_v3 = vcombine.low %v606_v59, %v610_v60  ;;  %v580_v28 = vld [vmem:[%s3633_s3 + $0x38] sm:$0xff]  ;;  %p2562_p2 = scmp.lt.s32.totalorder %s2560_s16, %s2554_s10 }
  0x1f   : > { %1004 = vmatpush1.bf16.msra.mxu1 %v2109_v35  ;;  %v2134_v55 = vcombine.high %v613_v48, %v617_v49  ;;  %v2548_v56 = vld [vmem:[%s2764_s30 + $0x24] ss:$8 sps:$4 sm:$0xff]   ;;  %v2550_v1 = vld [vmem:[%s2764_s30 + $0x20] ss:$8 sps:$4 sm:$0xff]   ;;  %v2133_v7 = vcombine.low %v613_v48, %v617_v49  ;;  %v2099_v31 = vcombine.low %v576_v26, %v580_v28  ;;  %v584_v44 = vld [vmem:[%s3633_s3 + $0x58] sm:$0xff] }
  0x20   : > { %2170 = vmatpush3.bf16.msra.mxu0 %v2535_v9  ;;  %1005 = vmatprep.subr.bf16.mxu1 %v2118_v37  ;;  %v618_v0 = vld [vmem:[%s3633_s3 + $0x168] sm:$0xff]  ;;  %v621_v8 = vld [vmem:[%s3633_s3 + $0x180] sm:$0xff]  ;;  %v596_v59 = vld [vmem:[%s3633_s3 + $0xb8] sm:$0xff]  ;;  %p2563_p3 = por %p2562_p2, %p2561_p1 }
  0x21   : > { %2171 = vmatprep.subr.bf16.mxu0 %v2536_v10  ;;  %v2136_v4 = vcombine.high %v614_v63, %v618_v0  ;;  %v2135_v5 = vcombine.low %v614_v63, %v618_v0  ;;  %v625_v9 = vld [vmem:[%s3633_s3 + $0x1a0] sm:$0xff]  ;;  %v622_v10 = vld [vmem:[%s3633_s3 + $0x188] sm:$0xff] }
  0x22   : > { %v2142_v11 = vcombine.high %v621_v8, %v625_v9  ;;  %v2141_v15 = vcombine.low %v621_v8, %v625_v9  ;;  %v629_v16 = vld [vmem:[%s3633_s3 + $0x1c0] sm:$0xff]  ;;  %v630_v18 = vld [vmem:[%s3633_s3 + $0x1c8] sm:$0xff]  ;;  %p2564_p5 = pnand %p2563_p3, %p2557_p0 }
  0x23   : > { %1006 = vmatpush1.bf16.msra.mxu1 %v2117_v45  ;;  %v633_v17 = vld [vmem:[%s3633_s3 + $0x1e0] sm:$0xff]  ;;  %v634_v20 = vld [vmem:[%s3633_s3 + $0x1e8] sm:$0xff]  ;;  %v588_v45 = vld [vmem:[%s3633_s3 + $0x78] sm:$0xff] }
  0x24   : > { %2172 = vmatpush3.bf16.msra.mxu0 %v2537_v12  ;;  %1007 = vmatprep.subr.bf16.mxu1 %v2126_v46  ;;  %v626_v12 = vld [vmem:[%s3633_s3 + $0x1a8] sm:$0xff]  ;;  %v2152_v22 = vcombine.high %v630_v18, %v634_v20  ;;  %v2149_v23 = vcombine.low %v629_v16, %v633_v17  ;;  %v2908_v34 = vld [vmem:[%s3632_s2] ss:$0 sm:$0xff]  ;;  %v2107_v63 = vcombine.low %v584_v44, %v588_v45 }
  0x25   : > { %2173 = vmatprep.subr.bf16.mxu0 %v2538_v13  ;;  %v2143_v13 = vcombine.low %v622_v10, %v626_v12  ;;  %v2144_v14 = vcombine.high %v622_v10, %v626_v12 }
  0x27   : > { %1008 = vmatpush1.bf16.msra.mxu1 %v2125_v53 }
  0x28   : > { %2174 = vmatpush3.bf16.msra.mxu0 %v2539_v19  ;;  %1009 = vmatprep.subr.bf16.mxu1 %v2134_v55  ;;  %v2150_v19 = vcombine.high %v629_v16, %v633_v17  ;;  %v591_v55 = vld [vmem:[%s3633_s3 + $0x90] sm:$0xff] }
  0x29   : > { %2175 = vmatprep.subr.bf16.mxu0 %v2540_v21  ;;  %v2151_v21 = vcombine.low %v630_v18, %v634_v20  ;;  %v607_v18 = vld [vmem:[%s3633_s3 + $0x110] sm:$0xff] }
  0x2a   : > { %v611_v20 = vld [vmem:[%s3633_s3 + $0x130] sm:$0xff] }
  0x2b   : > { %1010 = vmatpush1.bf16.msra.mxu1 %v2133_v7 }
  0x2c   : > { %2176 = vmatpush3.bf16.msra.mxu0 %v2541_v29  ;;  %1011 = vmatprep.subr.bf16.mxu1 %v2142_v11  ;;  %v2634_v29 = vmov 0  }
  0x2d   : > { %1072 = vmatprep.subr.bf16.mxu0 %v2096_v32  ;;  %1031 = vmatprep.mubr.bf16.mxu1 %v2634_v29  ;;  %v2100_v32 = vcombine.high %v576_v26, %v580_v28  ;;  %v2130_v28 = vcombine.high %v607_v18, %v611_v20 }
  0x2f   : > { %529 = vmatmul.mubr.bf16.vlgmr.msra.gmra.mrb[0].mxu0 %v2542_v36  ;;  %1012 = vmatpush1.bf16.msra.mxu1 %v2141_v15 }
  0x30   : > { %536 = vmatprep.mubr.bf16.mxu0 %v2545_v38  ;;  %1073 = vmatpush1.bf16.msra.mxu0 %v2095_v39 }
  0x31   : > { %1074 = vmatprep.subr.bf16.mxu0 %v2104_v42  ;;  %1013 = vmatprep.subr.bf16.mxu1 %v2150_v19  ;;  %v583_v42 = vld [vmem:[%s3633_s3 + $0x50] sm:$0xff] }
  0x32   : > { %v2106_v53 = vcombine.high %v583_v42, %v587_v43 }
  0x33   : > { %1014 = vmatpush1.bf16.msra.mxu1 %v2149_v23 }
  0x34   : > { %1075 = vmatpush1.bf16.msra.mxu0 %v2103_v47  ;;  %1145 = vmatprep.subr.bf16.mxu1 %v2098_v27 }
  0x35   : > { %1076 = vmatprep.subr.bf16.mxu0 %v2112_v50 }
  0x37   : > { %537 = vmatmul.mubr.bf16.gmra.mrb[4].mxu0 %v2547_v54  ;;  %v2108_v54 = vcombine.high %v584_v44, %v588_v45 }
  0x38   : > { %544 = vmatprep.mubr.bf16.mxu0 %v2548_v56  ;;  %1077 = vmatpush1.bf16.msra.mxu0 %v2111_v57  ;;  %v595_v57 = vld [vmem:[%s3633_s3 + $0xb0] sm:$0xff] }
  0x39   : > { %1078 = vmatprep.subr.bf16.mxu0 %v2120_v58  ;;  %v592_v58 = vld [vmem:[%s3633_s3 + $0x98] sm:$0xff]  ;;  %v2113_v11 = vcombine.low %v591_v55, %v595_v57 }
  0x3a   : > { %v2115_v12 = vcombine.low %v592_v58, %v596_v59 }
  0x3c   : > { %1079 = vmatpush1.bf16.msra.mxu0 %v2119_v61 }
  0x3d   : > { %1080 = vmatprep.subr.bf16.mxu0 %v2128_v62  ;;  %v2105_v62 = vcombine.low %v583_v42, %v587_v43 }
  0x3f   : > { %545 = vmatmul.mubr.bf16.gmra.mrb[8].mxu0 %v2550_v1  ;;  %v2114_v1 = vcombine.high %v591_v55, %v595_v57 }
  0x40   : > { %552 = vmatprep.mubr.bf16.mxu0 %v2551_v2  ;;  %1081 = vmatpush1.bf16.msra.mxu0 %v2127_v3  ;;  %v2116_v2 = vcombine.high %v592_v58, %v596_v59  ;;  %v599_v3 = vld [vmem:[%s3633_s3 + $0xd0] sm:$0xff] }
  0x41   : > { %1082 = vmatprep.subr.bf16.mxu0 %v2136_v4  ;;  %v603_v4 = vld [vmem:[%s3633_s3 + $0xf0] sm:$0xff] }
  0x42   : > { %v2121_v25 = vcombine.low %v599_v3, %v603_v4 }
  0x44   : > { %1083 = vmatpush1.bf16.msra.mxu0 %v2135_v5  ;;  %v600_v5 = vld [vmem:[%s3633_s3 + $0xd8] sm:$0xff] }
  0x45   : > { %1084 = vmatprep.subr.bf16.mxu0 %v2144_v14 }
  0x47   : > { %553 = vmatmul.mubr.bf16.gmra.mrb[12].mxu0 %v2553_v6  ;;  %v604_v6 = vld [vmem:[%s3633_s3 + $0xf8] sm:$0xff] }
  0x48   : > { %1085 = vmatpush1.bf16.msra.mxu0 %v2143_v13  ;;  %1104 = vmatprep.mubr.bf16.mxu0 %v2634_v29  ;;  %v2122_v13 = vcombine.high %v599_v3, %v603_v4  ;;  %v2124_v17 = vcombine.high %v600_v5, %v604_v6  ;;  %v2123_v26 = vcombine.low %v600_v5, %v604_v6 }
  0x49   : > { %1086 = vmatprep.subr.bf16.mxu0 %v2152_v22  ;;  %v612_v22 = vld [vmem:[%s3633_s3 + $0x138] sm:$0xff] }
  0x4c   : > { %1087 = vmatpush1.bf16.msra.mxu0 %v2151_v21  ;;  %v608_v21 = vld [vmem:[%s3633_s3 + $0x118] sm:$0xff] }
  0x4d   : > { %1218 = vmatprep.subr.bf16.mxu0 %v2100_v32  ;;  %v619_v32 = vld [vmem:[%s3633_s3 + $0x170] sm:$0xff] }
 0x102   : > { %v2177_v33 = vpop.f32.mrb[0].mxu0 }
 0x103   : > { %v2178_v35 = vpop.f32.mrb[1].mxu0 }
 0x104   : > { %v2179_v36 = vadd.f32 %v2178_v35, %v2177_v33  ;;  %v2180_v37 = vpop.f32.mrb[2].mxu0  ;;  %v616_v33 = vld [vmem:[%s3633_s3 + $0x158] sm:$0xff] }
 0x105   : > { %v2181_v38 = vpop.f32.mrb[3].mxu0  ;;  %v620_v35 = vld [vmem:[%s3633_s3 + $0x178] sm:$0xff] }
 0x106   : > { %v531_v39 = vadd.f32 %v2179_v36, %v2908_v34  ;;  %v2182_v40 = vadd.f32 %v2181_v38, %v2180_v37 }
 0x108   : > { %v534_v41 = vadd.f32 %v2182_v40, %v2908_v34  ;;  %v561_v46 = vmax.f32 %v531_v39, 0.0  ;;  %v2129_v40 = vcombine.low %v607_v18, %v611_v20  ;;  %v1543_v18 = vld [vmem:[%s3635_s5 + $0x90] sm:$0xff] }
 0x109   : > { %v1575_v20 = vld [vmem:[%s3635_s5 + $0x190] sm:$0xff] }
 0x10a   : > { %v562_v47 = vmax.f32 %v534_v41, 0.0  ;;  %v2183_v48 = vpop.f32.mrb[4].mxu0  ;;  %v2131_v41 = vcombine.low %v608_v21, %v612_v22 }
 0x10b   : > { %v2184_v49 = vpop.f32.mrb[5].mxu0 }
 0x10c   : > { %v2924_v50 = vpack.c.bf16 %v562_v47, %v561_v46  ;;  %v2185_v51 = vadd.f32 %v2184_v49, %v2183_v48  ;;  %v2186_v52 = vpop.f32.mrb[6].mxu0  ;;  %v2140_v46 = vcombine.high %v616_v33, %v620_v35  ;;  %v623_v47 = vld [vmem:[%s3633_s3 + $0x190] sm:$0xff] }
 0x10d   : > { %v2187_v56 = vpop.f32.mrb[7].mxu0  ;;  %v627_v49 = vld [vmem:[%s3633_s3 + $0x1b0] sm:$0xff] }
 0x10e   : > { %v539_v60 = vadd.f32 %v2185_v51, %v2908_v34  ;;  %v2188_v61 = vadd.f32 %v2187_v56, %v2186_v52  ;;  %1032 = vmatmul.mubr.bf16.vlgmr.msra.gmra.mrb[0].mxu1 %v2924_v50  ;;  %1105 = vmatmul.mubr.bf16.vlgmr.msra.gmra.mrb[16].mxu0 %v2924_v50  ;;  %v624_v51 = vld [vmem:[%s3633_s3 + $0x198] sm:$0xff]  ;;  %v2139_v56 = vcombine.low %v616_v33, %v620_v35  ;;  %v1577_v33 = vld [vmem:[%s3635_s5 + $0x1a0] sm:$0xff] }
 0x10f   : > { %1146 = vmatpush1.bf16.msra.mxu1 %v2097_v30  ;;  %1219 = vmatpush1.bf16.msra.mxu0 %v2099_v31  ;;  %v2132_v30 = vcombine.high %v608_v21, %v612_v22  ;;  %v615_v31 = vld [vmem:[%s3633_s3 + $0x150] sm:$0xff]  ;;  %v628_v52 = vld [vmem:[%s3633_s3 + $0x1b8] sm:$0xff]  ;;  %v2146_v58 = vcombine.high %v623_v47, %v627_v49 }
 0x110   : > { %v542_v0 = vadd.f32 %v2188_v61, %v2908_v34  ;;  %1147 = vmatprep.subr.bf16.mxu1 %v2106_v53  ;;  %1220 = vmatprep.subr.bf16.mxu0 %v2108_v54  ;;  %v563_v7 = vmax.f32 %v539_v60, 0.0  ;;  %v2138_v42 = vcombine.high %v615_v31, %v619_v32  ;;  %v2137_v55 = vcombine.low %v615_v31, %v619_v32  ;;  %v631_v60 = vld [vmem:[%s3633_s3 + $0x1d0] sm:$0xff]  ;;  %v1576_v22 = vld [vmem:[%s3635_s5 + $0x198] sm:$0xff]  ;;  %v1545_v31 = vld [vmem:[%s3635_s5 + $0xa0] sm:$0xff] }
 0x111   : > { %1041 = vmatprep.mubr.bf16.mxu1 %v2634_v29  ;;  %1114 = vmatprep.mubr.bf16.mxu0 %v2634_v29  ;;  %v2148_v59 = vcombine.high %v624_v51, %v628_v52  ;;  %v635_v61 = vld [vmem:[%s3633_s3 + $0x1f0] sm:$0xff]  ;;  %v1546_v32 = vld [vmem:[%s3635_s5 + $0xa8] sm:$0xff] }
 0x112   : > { %v564_v8 = vmax.f32 %v542_v0, 0.0  ;;  %v2189_v9 = vpop.f32.mrb[8].mxu0  ;;  %v2154_v4 = vcombine.high %v631_v60, %v635_v61  ;;  %v2153_v6 = vcombine.low %v631_v60, %v635_v61  ;;  %v2349_v35 = vpack.c.bf16 %v1546_v32, %v1545_v31  ;;  %v1582_v61 = vld [vmem:[%s3635_s5 + $0x1c8] sm:$0xff]  ;;  %v1588_v31 = vld [vmem:[%s3635_s5 + $0x1f8] sm:$0xff]  ;;  %v1539_v32 = vld [vmem:[%s3635_s5 + $0x70] sm:$0xff] }
 0x113   : > { %1148 = vmatpush1.bf16.msra.mxu1 %v2105_v62  ;;  %1221 = vmatpush1.bf16.msra.mxu0 %v2107_v63  ;;  %v2190_v10 = vpop.f32.mrb[9].mxu0  ;;  %v636_v62 = vld [vmem:[%s3633_s3 + $0x1f8] sm:$0xff] }
 0x114   : > { %v2956_v14 = vpack.c.bf16 %v564_v8, %v563_v7  ;;  %v2191_v15 = vadd.f32 %v2190_v10, %v2189_v9  ;;  %v2192_v16 = vpop.f32.mrb[10].mxu0  ;;  %1149 = vmatprep.subr.bf16.mxu1 %v2114_v1  ;;  %1222 = vmatprep.subr.bf16.mxu0 %v2116_v2  ;;  %v2145_v1 = vcombine.low %v623_v47, %v627_v49  ;;  %v1542_v8 = vld [vmem:[%s3635_s5 + $0x88] sm:$0xff]  ;;  %v1573_v9 = vld [vmem:[%s3635_s5 + $0x180] sm:$0xff]  ;;  %v1531_v49 = vld [vmem:[%s3635_s5 + $0x30] sm:$0xff] }
 0x115   : > { %v2193_v19 = vpop.f32.mrb[11].mxu0  ;;  %v2147_v2 = vcombine.low %v624_v51, %v628_v52  ;;  %v1532_v51 = vld [vmem:[%s3635_s5 + $0x38] sm:$0xff] }
 0x116   : > { %v547_v23 = vadd.f32 %v2191_v15, %v2908_v34  ;;  %v2194_v24 = vadd.f32 %v2193_v19, %v2192_v16  ;;  %1042 = vmatmul.mubr.bf16.gmra.mrb[4].mxu1 %v2956_v14  ;;  %1115 = vmatmul.mubr.bf16.gmra.mrb[20].mxu0 %v2956_v14  ;;  %v1557_v15 = vld [vmem:[%s3635_s5 + $0x100] sm:$0xff]  ;;  %v1558_v16 = vld [vmem:[%s3635_s5 + $0x108] sm:$0xff]  ;;  %v1544_v19 = vld [vmem:[%s3635_s5 + $0x98] sm:$0xff] }
 0x117   : > { %1150 = vmatpush1.bf16.msra.mxu1 %v2113_v11  ;;  %1223 = vmatpush1.bf16.msra.mxu0 %v2115_v12  ;;  %v1574_v11 = vld [vmem:[%s3635_s5 + $0x188] sm:$0xff]  ;;  %v2345_v21 = vpack.c.bf16 %v1544_v19, %v1543_v18  ;;  %v1537_v19 = vld [vmem:[%s3635_s5 + $0x60] sm:$0xff] }
 0x118   : > { %v550_v27 = vadd.f32 %v2194_v24, %v2908_v34  ;;  %1151 = vmatprep.subr.bf16.mxu1 %v2122_v13  ;;  %1224 = vmatprep.subr.bf16.mxu0 %v2124_v17  ;;  %v565_v36 = vmax.f32 %v547_v23, 0.0  ;;  %v1526_v12 = vld [vmem:[%s3635_s5 + $0x8] sm:$0xff]  ;;  %v2373_v13 = vpack.c.bf16 %v1574_v11, %v1573_v9  ;;  %v2375_v17 = vpack.c.bf16 %v1558_v16, %v1557_v15  ;;  %v1527_v23 = vld [vmem:[%s3635_s5 + $0x10] sm:$0xff]  ;;  %v1528_v24 = vld [vmem:[%s3635_s5 + $0x18] sm:$0xff] }
 0x119   : > { %1051 = vmatprep.mubr.bf16.mxu1 %v2634_v29  ;;  %1124 = vmatprep.mubr.bf16.mxu0 %v2634_v29  ;;  %v1536_v9 = vld [vmem:[%s3635_s5 + $0x58] sm:$0xff]  ;;  %v1554_v15 = vld [vmem:[%s3635_s5 + $0xe8] sm:$0xff]  ;;  %v1585_v16 = vld [vmem:[%s3635_s5 + $0x1e0] sm:$0xff] }
 0x11a   : > { %v566_v37 = vmax.f32 %v550_v27, 0.0  ;;  %v2195_v38 = vpop.f32.mrb[12].mxu0  ;;  %v1559_v27 = vld [vmem:[%s3635_s5 + $0x110] sm:$0xff]  ;;  %v1586_v18 = vld [vmem:[%s3635_s5 + $0x1e8] sm:$0xff] }
 0x11b   : > { %1152 = vmatpush1.bf16.msra.mxu1 %v2121_v25  ;;  %1225 = vmatpush1.bf16.msra.mxu0 %v2123_v26  ;;  %v2196_v39 = vpop.f32.mrb[13].mxu0  ;;  %v2377_v25 = vpack.c.bf16 %v1576_v22, %v1575_v20  ;;  %v2347_v26 = vpack.c.bf16 %v1528_v24, %v1527_v23  ;;  %v1538_v20 = vld [vmem:[%s3635_s5 + $0x68] sm:$0xff]  ;;  %v1569_v23 = vld [vmem:[%s3635_s5 + $0x160] sm:$0xff] }
 0x11c   : > { %v571_v43 = vpack.c.bf16 %v566_v37, %v565_v36  ;;  %v2197_v44 = vadd.f32 %v2196_v39, %v2195_v38  ;;  %v2198_v45 = vpop.f32.mrb[14].mxu0  ;;  %1153 = vmatprep.subr.bf16.mxu1 %v2130_v28  ;;  %1226 = vmatprep.subr.bf16.mxu0 %v2132_v30  ;;  %v1560_v28 = vld [vmem:[%s3635_s5 + $0x118] sm:$0xff]  ;;  %v1578_v36 = vld [vmem:[%s3635_s5 + $0x1a8] sm:$0xff]  ;;  %v1529_v37 = vld [vmem:[%s3635_s5 + $0x20] sm:$0xff]  ;;  %v2367_v22 = vpack.c.bf16 %v1538_v20, %v1537_v19 }
 0x11d   : > { %v2199_v48 = vpop.f32.mrb[15].mxu0  ;;  %v2379_v30 = vpack.c.bf16 %v1560_v28, %v1559_v27  ;;  %v1530_v38 = vld [vmem:[%s3635_s5 + $0x28] sm:$0xff]  ;;  %v2381_v39 = vpack.c.bf16 %v1578_v36, %v1577_v33  ;;  %v1556_v27 = vld [vmem:[%s3635_s5 + $0xf8] sm:$0xff]  ;;  %v1587_v28 = vld [vmem:[%s3635_s5 + $0x1f0] sm:$0xff] }
 0x11e   : > { %v555_v53 = vadd.f32 %v2197_v44, %v2908_v34  ;;  %v2200_v54 = vadd.f32 %v2199_v48, %v2198_v45  ;;  %1052 = vmatmul.mubr.bf16.gmra.mrb[8].mxu1 %v571_v43  ;;  %1125 = vmatmul.mubr.bf16.gmra.mrb[24].mxu0 %v571_v43  ;;  %v1547_v44 = vld [vmem:[%s3635_s5 + $0xb0] sm:$0xff]  ;;  %v1548_v45 = vld [vmem:[%s3635_s5 + $0xb8] sm:$0xff]  ;;  %v1570_v24 = vld [vmem:[%s3635_s5 + $0x168] sm:$0xff] }
 0x11f   : > { %1154 = vmatpush1.bf16.msra.mxu1 %v2129_v40  ;;  %1227 = vmatpush1.bf16.msra.mxu0 %v2131_v41  ;;  %v2351_v40 = vpack.c.bf16 %v1530_v38, %v1529_v37  ;;  %v1561_v41 = vld [vmem:[%s3635_s5 + $0x120] sm:$0xff]  ;;  %v2353_v47 = vpack.c.bf16 %v1548_v45, %v1547_v44  ;;  %v1580_v48 = vld [vmem:[%s3635_s5 + $0x1b8] sm:$0xff]  ;;  %v1571_v37 = vld [vmem:[%s3635_s5 + $0x170] sm:$0xff] }
 0x120   : > { %v558_v57 = vadd.f32 %v2200_v54, %v2908_v34  ;;  %1155 = vmatprep.subr.bf16.mxu1 %v2138_v42  ;;  %1228 = vmatprep.subr.bf16.mxu0 %v2140_v46  ;;  %v632_v34 = vld [vmem:[%s3633_s3 + $0x1d8] sm:$0xff]  ;;  %v567_v63 = vmax.f32 %v555_v53, 0.0  ;;  %v1562_v42 = vld [vmem:[%s3635_s5 + $0x128] sm:$0xff]  ;;  %v1579_v46 = vld [vmem:[%s3635_s5 + $0x1b0] sm:$0xff]  ;;  %v2355_v53 = vpack.c.bf16 %v1532_v51, %v1531_v49 }
 0x121   : > { %1061 = vmatprep.mubr.bf16.mxu1 %v2634_v29  ;;  %1134 = vmatprep.mubr.bf16.mxu0 %v2634_v29  ;;  %v2156_v5 = vcombine.high %v632_v34, %v636_v62  ;;  %v2155_v7 = vcombine.low %v632_v34, %v636_v62  ;;  %v2385_v52 = vpack.c.bf16 %v1580_v48, %v1579_v46  ;;  %v1563_v54 = vld [vmem:[%s3635_s5 + $0x130] sm:$0xff]  ;;  %v1533_v34 = vld [vmem:[%s3635_s5 + $0x40] sm:$0xff]  ;;  %v1534_v62 = vld [vmem:[%s3635_s5 + $0x48] sm:$0xff]  ;;  %v639_v46 = vlaneseq }
 0x122   : > { %v568_v0 = vmax.f32 %v558_v57, 0.0  ;;  %v1549_v57 = vld [vmem:[%s3635_s5 + $0xc0] sm:$0xff]  ;;  %v1540_v33 = vld [vmem:[%s3635_s5 + $0x78] sm:$0xff]  ;;  %v1638_v44 = vld [vmem:[%s3635_s5 + $0x388] sm:$0xff] }
 0x123   : > { %1156 = vmatpush1.bf16.msra.mxu1 %v2137_v55  ;;  %1229 = vmatpush1.bf16.msra.mxu0 %v2139_v56  ;;  %v1564_v55 = vld [vmem:[%s3635_s5 + $0x138] sm:$0xff]  ;;  %v2371_v36 = vpack.c.bf16 %v1540_v33, %v1539_v32  ;;  %v3239_v51 = vld [vmem:[%s3634_s4] sm:$0xff] }
 0x124   : > { %v572_v3 = vpack.c.bf16 %v568_v0, %v567_v63  ;;  %1157 = vmatprep.subr.bf16.mxu1 %v2146_v58  ;;  %1230 = vmatprep.subr.bf16.mxu0 %v2148_v59  ;;  %v2387_v56 = vpack.c.bf16 %v1564_v55, %v1563_v54  ;;  %v1550_v58 = vld [vmem:[%s3635_s5 + $0xc8] sm:$0xff]  ;;  %v1581_v59 = vld [vmem:[%s3635_s5 + $0x1c0] sm:$0xff]  ;;  %v2359_v0 = vpack.c.bf16 %v1534_v62, %v1533_v34  ;;  %v1572_v38 = vld [vmem:[%s3635_s5 + $0x178] sm:$0xff] }
 0x125   : > { %v2357_v60 = vpack.c.bf16 %v1550_v58, %v1549_v57  ;;  %v2389_v63 = vpack.c.bf16 %v1582_v61, %v1581_v59 }
 0x126   : > { %1062 = vmatmul.mubr.bf16.gmra.mrb[12].mxu1 %v572_v3  ;;  %1135 = vmatmul.mubr.bf16.gmra.mrb[28].mxu0 %v572_v3 }
 0x127   : > { %1158 = vmatpush1.bf16.msra.mxu1 %v2145_v1  ;;  %1231 = vmatpush1.bf16.msra.mxu0 %v2147_v2  ;;  %v1565_v1 = vld [vmem:[%s3635_s5 + $0x140] sm:$0xff]  ;;  %v1566_v2 = vld [vmem:[%s3635_s5 + $0x148] sm:$0xff] }
 0x128   : > { %1159 = vmatprep.subr.bf16.mxu1 %v2154_v4  ;;  %1232 = vmatprep.subr.bf16.mxu0 %v2156_v5  ;;  %v1551_v4 = vld [vmem:[%s3635_s5 + $0xd0] sm:$0xff]  ;;  %v1552_v5 = vld [vmem:[%s3635_s5 + $0xd8] sm:$0xff] }
 0x129   : > { %1177 = vmatprep.mubr.bf16.mxu1 %v2634_v29  ;;  %1250 = vmatprep.mubr.bf16.mxu0 %v2634_v29 }
 0x12b   : > { %1160 = vmatpush1.bf16.msra.mxu1 %v2153_v6  ;;  %1233 = vmatpush1.bf16.msra.mxu0 %v2155_v7  ;;  %v1583_v6 = vld [vmem:[%s3635_s5 + $0x1d0] sm:$0xff]  ;;  %v2361_v7 = vpack.c.bf16 %v1552_v5, %v1551_v4 }
 0x12c   : > { %2374 = vmatprep.subr.bf16.mxu0 %v2373_v13 }
 0x12e   : > { %1178 = vmatmul.mubr.bf16.vlgmr.msra.gmra.mrb[16].mxu1 %v2924_v50  ;;  %1251 = vmatmul.mubr.bf16.vlgmr.msra.gmra.mrb[32].mxu0 %v2924_v50  ;;  %v1541_v50 = vld [vmem:[%s3635_s5 + $0x80] sm:$0xff] }
 0x12f   : > { %1187 = vmatprep.mubr.bf16.mxu1 %v2634_v29  ;;  %1260 = vmatprep.mubr.bf16.mxu0 %v2634_v29  ;;  %v2341_v10 = vpack.c.bf16 %v1542_v8, %v1541_v50  ;;  %v1584_v50 = vld [vmem:[%s3635_s5 + $0x1d8] sm:$0xff]  ;;  %v1535_v8 = vld [vmem:[%s3635_s5 + $0x50] sm:$0xff] }
 0x130   : > { %2376 = vmatpush3.bf16.msra.mxu0 %v2375_v17  ;;  %v2363_v11 = vpack.c.bf16 %v1536_v9, %v1535_v8 }
 0x131   : > { %2342 = vmatprep.subr.bf16.mxu1 %v2341_v10  ;;  %2378 = vmatprep.subr.bf16.mxu0 %v2377_v25  ;;  %v2393_v10 = vpack.c.bf16 %v1584_v50, %v1583_v6  ;;  %v2399_v25 = vpack.c.bf16 %v1570_v24, %v1569_v23 }
 0x134   : > { %2380 = vmatpush3.bf16.msra.mxu0 %v2379_v30 }
 0x135   : > { %2382 = vmatprep.subr.bf16.mxu0 %v2381_v39  ;;  %v2403_v39 = vpack.c.bf16 %v1572_v38, %v1571_v37 }
 0x136   : > { %1188 = vmatmul.mubr.bf16.gmra.mrb[20].mxu1 %v2956_v14  ;;  %1261 = vmatmul.mubr.bf16.gmra.mrb[36].mxu0 %v2956_v14 }
 0x137   : > { %1197 = vmatprep.mubr.bf16.mxu1 %v2634_v29  ;;  %1270 = vmatprep.mubr.bf16.mxu0 %v2634_v29 }
 0x13e   : > { %1198 = vmatmul.mubr.bf16.gmra.mrb[24].mxu1 %v571_v43  ;;  %1271 = vmatmul.mubr.bf16.gmra.mrb[40].mxu0 %v571_v43  ;;  %v2383_v43 = vpack.c.bf16 %v1562_v42, %v1561_v41  ;;  %v1606_v41 = vld [vmem:[%s3635_s5 + $0x288] sm:$0xff]  ;;  %v1637_v42 = vld [vmem:[%s3635_s5 + $0x380] sm:$0xff] }
 0x13f   : > { %1207 = vmatprep.mubr.bf16.mxu1 %v2634_v29  ;;  %1280 = vmatprep.mubr.bf16.mxu0 %v2634_v29  ;;  %v1525_v29 = vld [vmem:[%s3635_s5] sm:$0xff]  ;;  %v2437_v45 = vpack.c.bf16 %v1638_v44, %v1637_v42 }
 0x140   : > { %v2343_v14 = vpack.c.bf16 %v1526_v12, %v1525_v29  ;;  %2384 = vmatpush3.bf16.msra.mxu0 %v2383_v43  ;;  %v1567_v29 = vld [vmem:[%s3635_s5 + $0x150] sm:$0xff]  ;;  %v1568_v12 = vld [vmem:[%s3635_s5 + $0x158] sm:$0xff] }
 0x141   : > { %2386 = vmatprep.subr.bf16.mxu0 %v2385_v52  ;;  %v2395_v13 = vpack.c.bf16 %v1568_v12, %v1567_v29 }
 0x142   : > { %2344 = vmatpush3.bf16.msra.mxu1 %v2343_v14  ;;  %v1553_v14 = vld [vmem:[%s3635_s5 + $0xe0] sm:$0xff] }
 0x143   : > { %2346 = vmatprep.subr.bf16.mxu1 %v2345_v21  ;;  %v2365_v17 = vpack.c.bf16 %v1554_v15, %v1553_v14  ;;  %v2397_v21 = vpack.c.bf16 %v1586_v18, %v1585_v16 }
 0x144   : > { %2388 = vmatpush3.bf16.msra.mxu0 %v2387_v56 }
 0x145   : > { %2390 = vmatprep.subr.bf16.mxu0 %v2389_v63 }
 0x146   : > { %1208 = vmatmul.mubr.bf16.gmra.mrb[28].mxu1 %v572_v3  ;;  %1281 = vmatmul.mubr.bf16.gmra.mrb[44].mxu0 %v572_v3  ;;  %v2391_v3 = vpack.c.bf16 %v1566_v2, %v1565_v1 }
 0x147   : > { %2348 = vmatpush3.bf16.msra.mxu1 %v2347_v26  ;;  %v1555_v26 = vld [vmem:[%s3635_s5 + $0xf0] sm:$0xff] }
 0x148   : > { %2350 = vmatprep.subr.bf16.mxu1 %v2349_v35  ;;  %2392 = vmatpush3.bf16.msra.mxu0 %v2391_v3  ;;  %v2369_v30 = vpack.c.bf16 %v1556_v27, %v1555_v26  ;;  %v2401_v35 = vpack.c.bf16 %v1588_v31, %v1587_v28 }
 0x149   : > { %2394 = vmatprep.subr.bf16.mxu0 %v2393_v10 }
 0x14b   : > { %2352 = vmatpush3.bf16.msra.mxu1 %v2351_v40  ;;  %v1605_v40 = vld [vmem:[%s3635_s5 + $0x280] sm:$0xff] }
 0x14c   : > { %2354 = vmatprep.subr.bf16.mxu1 %v2353_v47  ;;  %2396 = vmatpush3.bf16.msra.mxu0 %v2395_v13  ;;  %v2405_v43 = vpack.c.bf16 %v1606_v41, %v1605_v40  ;;  %v3232_v47 = vshrl.u32 %v639_v46, 7 }
 0x14d   : > { %2398 = vmatprep.subr.bf16.mxu0 %v2397_v21 }
 0x14e   : > { %v641_v48 = vsub.s32 0, %v3232_v47  ;;  %v649_v49 = vsub.s32 2, %v3232_v47  ;;  %v645_v52 = vsub.s32 1, %v3232_v47 }
 0x14f   : > { %2356 = vmatpush3.bf16.msra.mxu1 %v2355_v53  ;;  %v653_v53 = vsub.s32 3, %v3232_v47 }
 0x150   : > { %2358 = vmatprep.subr.bf16.mxu1 %v2357_v60  ;;  %2400 = vmatpush3.bf16.msra.mxu0 %v2399_v25  ;;  %v3246_v54 = vrot.slane %v3239_v51, %v641_v48  ;;  %v3251_v55 = vrot.slane %v3239_v51, %v649_v49  ;;  %v3256_v56 = vrot.slane %v3239_v51, %v645_v52 }
 0x151   : > { %2402 = vmatprep.subr.bf16.mxu0 %v2401_v35  ;;  %v3261_v57 = vrot.slane %v3239_v51, %v653_v53 }
 0x153   : > { %2360 = vmatpush3.bf16.msra.mxu1 %v2359_v0 }
 0x154   : > { %2362 = vmatprep.subr.bf16.mxu1 %v2361_v7  ;;  %2404 = vmatpush3.bf16.msra.mxu0 %v2403_v39 }
 0x155   : > { %2438 = vmatprep.subr.bf16.mxu0 %v2437_v45 }
 0x157   : > { %2364 = vmatpush3.bf16.msra.mxu1 %v2363_v11 }
 0x158   : > { %2366 = vmatprep.subr.bf16.mxu1 %v2365_v17 }
 0x15b   : > { %2368 = vmatpush3.bf16.msra.mxu1 %v2367_v22 }
 0x15c   : > { %2370 = vmatprep.subr.bf16.mxu1 %v2369_v30 }
 0x15f   : > { %2372 = vmatpush3.bf16.msra.mxu1 %v2371_v36 }
 0x160   : > { %2406 = vmatprep.subr.bf16.mxu1 %v2405_v43 }
 0x1e1   : > { %v1033_v58 = vpop.f32.mrb[0].mxu1  ;;  %v1106_v59 = vpop.f32.mrb[16].mxu0 }
 0x1e2   : > { %v1034_v60 = vadd.f32 %v1033_v58, %v3246_v54  ;;  %v1107_v61 = vadd.f32 %v1106_v59, %v3251_v55  ;;  %v1035_v34 = vpop.f32.mrb[1].mxu1  ;;  %v1108_v62 = vpop.f32.mrb[17].mxu0 }
 0x1e3   : > { %v1036_v63 = vadd.f32 %v1035_v34, %v3256_v56  ;;  %v1109_v0 = vadd.f32 %v1108_v62, %v3261_v57  ;;  %v1037_v1 = vpop.f32.mrb[2].mxu1  ;;  %v1110_v2 = vpop.f32.mrb[18].mxu0 }
 0x1e4   : > { %v1038_v3 = vadd.f32 %v1037_v1, %v3246_v54  ;;  %v1111_v4 = vadd.f32 %v1110_v2, %v3251_v55  ;;  %v1039_v5 = vpop.f32.mrb[3].mxu1  ;;  %v1112_v6 = vpop.f32.mrb[19].mxu0  ;;  %v1291_v8 = vmax.f32 %v1034_v60, 0.0  ;;  %v1293_v9 = vmax.f32 %v1107_v61, 0.0 }
 0x1e5   : > { %v1040_v7 = vadd.f32 %v1039_v5, %v3256_v56  ;;  %v1113_v50 = vadd.f32 %v1112_v6, %v3261_v57  ;;  %v1292_v29 = vmax.f32 %v1036_v63, 0.0  ;;  %v1294_v12 = vmax.f32 %v1109_v0, 0.0 }
 0x1e6   : > { %v1299_v10 = vmax.f32 %v1038_v3, 0.0  ;;  %v1301_v11 = vmax.f32 %v1111_v4, 0.0  ;;  %v657_v1 = vsub.s32 4, %v3232_v47  ;;  %v665_v6 = vsub.s32 6, %v3232_v47 }
 0x1e7   : > { %v1300_v13 = vmax.f32 %v1040_v7, 0.0  ;;  %v1302_v14 = vmax.f32 %v1113_v50, 0.0  ;;  %v661_v7 = vsub.s32 5, %v3232_v47 }
 0x1e8   : > { %v1356_v15 = vadd.f32 %v1299_v10, %v1291_v8  ;;  %v1382_v16 = vadd.f32 %v1301_v11, %v1293_v9  ;;  %v2635_v11 = vmov 1966171168  }
 0x1e9   : > { %v1369_v17 = vadd.f32 %v1300_v13, %v1292_v29  ;;  %v1395_v18 = vadd.f32 %v1302_v14, %v1294_v12  ;;  %v1043_v19 = vpop.f32.mrb[4].mxu1  ;;  %v1116_v20 = vpop.f32.mrb[20].mxu0  ;;  %v1473_v29 = vunpack.c.l.s4 %v2635_v11  ;;  %v669_v12 = vsub.s32 7, %v3232_v47 }
 0x1ea   : > { %v1044_v21 = vadd.f32 %v1043_v19, %v3246_v54  ;;  %v1117_v22 = vadd.f32 %v1116_v20, %v3251_v55  ;;  %v1045_v23 = vpop.f32.mrb[5].mxu1  ;;  %v1118_v24 = vpop.f32.mrb[21].mxu0 }
 0x1eb   : > { %v1046_v25 = vadd.f32 %v1045_v23, %v3256_v56  ;;  %v1119_v26 = vadd.f32 %v1118_v24, %v3261_v57  ;;  %v1047_v27 = vpop.f32.mrb[6].mxu1  ;;  %v1120_v28 = vpop.f32.mrb[22].mxu0 }
 0x1ec   : > { %v1307_v30 = vmax.f32 %v1044_v21, 0.0  ;;  %v1309_v31 = vmax.f32 %v1117_v22, 0.0  ;;  %v1048_v32 = vadd.f32 %v1047_v27, %v3246_v54  ;;  %v1121_v33 = vadd.f32 %v1120_v28, %v3251_v55  ;;  %v1049_v35 = vpop.f32.mrb[7].mxu1  ;;  %v1122_v36 = vpop.f32.mrb[23].mxu0 }
 0x1ed   : > { %v1308_v37 = vmax.f32 %v1046_v25, 0.0  ;;  %v1310_v38 = vmax.f32 %v1119_v26, 0.0  ;;  %v1050_v39 = vadd.f32 %v1049_v35, %v3256_v56  ;;  %v1123_v40 = vadd.f32 %v1122_v36, %v3261_v57 }
 0x1ee   : > { %v1357_v41 = vadd.f32 %v1356_v15, %v1307_v30  ;;  %v1383_v42 = vadd.f32 %v1382_v16, %v1309_v31  ;;  %v1315_v43 = vmax.f32 %v1048_v32, 0.0  ;;  %v1317_v44 = vmax.f32 %v1121_v33, 0.0 }
 0x1ef   : > { %v1370_v45 = vadd.f32 %v1369_v17, %v1308_v37  ;;  %v1396_v46 = vadd.f32 %v1395_v18, %v1310_v38  ;;  %v1316_v58 = vmax.f32 %v1050_v39, 0.0  ;;  %v1318_v59 = vmax.f32 %v1123_v40, 0.0 }
 0x1f0   : > { %v1358_v60 = vadd.f32 %v1357_v41, %v1315_v43  ;;  %v1384_v61 = vadd.f32 %v1383_v42, %v1317_v44  ;;  %v3294_v39 = vrot.slane %v3239_v51, %v657_v1  ;;  %v3301_v44 = vrot.slane %v3239_v51, %v665_v6 }
 0x1f1   : > { %v1371_v34 = vadd.f32 %v1370_v45, %v1316_v58  ;;  %v1397_v62 = vadd.f32 %v1396_v46, %v1318_v59  ;;  %v1053_v63 = vpop.f32.mrb[8].mxu1  ;;  %v1126_v0 = vpop.f32.mrb[24].mxu0  ;;  %v3306_v45 = vrot.slane %v3239_v51, %v661_v7 }
 0x1f2   : > { %v1054_v2 = vadd.f32 %v1053_v63, %v3246_v54  ;;  %v1127_v3 = vadd.f32 %v1126_v0, %v3251_v55  ;;  %v1055_v4 = vpop.f32.mrb[9].mxu1  ;;  %v1128_v5 = vpop.f32.mrb[25].mxu0 }
 0x1f3   : > { %v1056_v50 = vadd.f32 %v1055_v4, %v3256_v56  ;;  %v1129_v8 = vadd.f32 %v1128_v5, %v3261_v57  ;;  %v1057_v9 = vpop.f32.mrb[10].mxu1  ;;  %v1130_v10 = vpop.f32.mrb[26].mxu0 }
 0x1f4   : > { %v1323_v13 = vmax.f32 %v1054_v2, 0.0  ;;  %v1325_v14 = vmax.f32 %v1127_v3, 0.0  ;;  %v1058_v15 = vadd.f32 %v1057_v9, %v3246_v54  ;;  %v1131_v16 = vadd.f32 %v1130_v10, %v3251_v55  ;;  %v1059_v17 = vpop.f32.mrb[11].mxu1  ;;  %v1132_v18 = vpop.f32.mrb[27].mxu0 }
 0x1f5   : > { %v1324_v19 = vmax.f32 %v1056_v50, 0.0  ;;  %v1326_v20 = vmax.f32 %v1129_v8, 0.0  ;;  %v1060_v21 = vadd.f32 %v1059_v17, %v3256_v56  ;;  %v1133_v22 = vadd.f32 %v1132_v18, %v3261_v57 }
 0x1f6   : > { %v1359_v23 = vadd.f32 %v1358_v60, %v1323_v13  ;;  %v1385_v24 = vadd.f32 %v1384_v61, %v1325_v14  ;;  %v1331_v25 = vmax.f32 %v1058_v15, 0.0  ;;  %v1333_v26 = vmax.f32 %v1131_v16, 0.0 }
 0x1f7   : > { %v1372_v27 = vadd.f32 %v1371_v34, %v1324_v19  ;;  %v1398_v28 = vadd.f32 %v1397_v62, %v1326_v20  ;;  %v1332_v30 = vmax.f32 %v1060_v21, 0.0  ;;  %v1334_v31 = vmax.f32 %v1133_v22, 0.0 }
 0x1f8   : > { %v1360_v32 = vadd.f32 %v1359_v23, %v1331_v25  ;;  %v1386_v33 = vadd.f32 %v1385_v24, %v1333_v26  ;;  %v1474_v61 = vunpack.c.0.s8 %v1473_v29  ;;  %v3313_v34 = vrot.slane %v3239_v51, %v669_v12 }
 0x1f9   : > { %v1373_v35 = vadd.f32 %v1372_v27, %v1332_v30  ;;  %v1399_v36 = vadd.f32 %v1398_v28, %v1334_v31  ;;  %v1063_v37 = vpop.f32.mrb[12].mxu1  ;;  %v1136_v38 = vpop.f32.mrb[28].mxu0 }
 0x1fa   : > { %v1064_v40 = vadd.f32 %v1063_v37, %v3246_v54  ;;  %v1137_v41 = vadd.f32 %v1136_v38, %v3251_v55  ;;  %v1065_v42 = vpop.f32.mrb[13].mxu1  ;;  %v1138_v43 = vpop.f32.mrb[29].mxu0 }
 0x1fb   : > { %v1066_v46 = vadd.f32 %v1065_v42, %v3256_v56  ;;  %v1139_v58 = vadd.f32 %v1138_v43, %v3261_v57  ;;  %v1067_v59 = vpop.f32.mrb[14].mxu1  ;;  %v1140_v60 = vpop.f32.mrb[30].mxu0 }
 0x1fc   : > { %v1339_v62 = vmax.f32 %v1064_v40, 0.0  ;;  %v1341_v63 = vmax.f32 %v1137_v41, 0.0  ;;  %v1068_v0 = vadd.f32 %v1067_v59, %v3246_v54  ;;  %v1141_v2 = vadd.f32 %v1140_v60, %v3251_v55  ;;  %v1069_v3 = vpop.f32.mrb[15].mxu1  ;;  %v1142_v4 = vpop.f32.mrb[31].mxu0 }
 0x1fd   : > { %v1340_v5 = vmax.f32 %v1066_v46, 0.0  ;;  %v1342_v50 = vmax.f32 %v1139_v58, 0.0  ;;  %v1070_v8 = vadd.f32 %v1069_v3, %v3256_v56  ;;  %v1143_v9 = vadd.f32 %v1142_v4, %v3261_v57 }
 0x1fe   : > { %v1361_v10 = vadd.f32 %v1360_v32, %v1339_v62  ;;  %v1387_v11 = vadd.f32 %v1386_v33, %v1341_v63  ;;  %v1347_v29 = vmax.f32 %v1068_v0, 0.0  ;;  %v1349_v13 = vmax.f32 %v1141_v2, 0.0 }
 0x1ff   : > { %v1374_v51 = vadd.f32 %v1373_v35, %v1340_v5  ;;  %v1400_v14 = vadd.f32 %v1399_v36, %v1342_v50  ;;  %v1348_v15 = vmax.f32 %v1070_v8, 0.0  ;;  %v1350_v16 = vmax.f32 %v1143_v9, 0.0 }
 0x200   : > { %v1362_v17 = vadd.f32 %v1361_v10, %v1347_v29  ;;  %v1388_v54 = vadd.f32 %v1387_v11, %v1349_v13  ;;  %v3320_v55 = vsub.s32 %v1474_v61, %v3232_v47 }
 0x201   : > { %v1375_v18 = vadd.f32 %v1374_v51, %v1348_v15  ;;  %v1401_v19 = vadd.f32 %v1400_v14, %v1350_v16  ;;  %v1179_v20 = vpop.f32.mrb[16].mxu1  ;;  %v1252_v21 = vpop.f32.mrb[32].mxu0 }
 0x202   : > { %v1363_v56 = vrot.slane %v1362_v17, 4  ;;  %v1389_v22 = vrot.slane %v1388_v54, 4  ;;  %v1180_v57 = vadd.f32 %v1179_v20, %v3294_v39  ;;  %v1253_v23 = vadd.f32 %v1252_v21, %v3301_v44  ;;  %v1181_v24 = vpop.f32.mrb[17].mxu1  ;;  %v1254_v25 = vpop.f32.mrb[33].mxu0 }
 0x203   : > { %v1376_v26 = vrot.slane %v1375_v18, 4  ;;  %v1402_v27 = vrot.slane %v1401_v19, 4  ;;  %v1182_v28 = vadd.f32 %v1181_v24, %v3306_v45  ;;  %v1255_v30 = vadd.f32 %v1254_v25, %v3313_v34  ;;  %v1183_v31 = vpop.f32.mrb[18].mxu1  ;;  %v1256_v32 = vpop.f32.mrb[34].mxu0 }
 0x204   : > { %v1364_v33 = vadd.f32 %v1363_v56, %v1362_v17  ;;  %v1390_v35 = vadd.f32 %v1389_v22, %v1388_v54  ;;  %v1295_v36 = vmax.f32 %v1180_v57, 0.0  ;;  %v1297_v37 = vmax.f32 %v1253_v23, 0.0  ;;  %v1185_v38 = vpop.f32.mrb[19].mxu1  ;;  %v1258_v40 = vpop.f32.mrb[35].mxu0 }
 0x205   : > { %v1377_v41 = vadd.f32 %v1376_v26, %v1375_v18  ;;  %v1403_v42 = vadd.f32 %v1402_v27, %v1401_v19  ;;  %v1296_v43 = vmax.f32 %v1182_v28, 0.0  ;;  %v1298_v46 = vmax.f32 %v1255_v30, 0.0 }
 0x206   : > { %v1365_v58 = vrot.slane %v1364_v33, 2  ;;  %v1391_v59 = vrot.slane %v1390_v35, 2  ;;  %v1184_v60 = vadd.f32 %v1183_v31, %v3294_v39  ;;  %v1257_v61 = vadd.f32 %v1256_v32, %v3301_v44 }
 0x207   : > { %v1378_v62 = vrot.slane %v1377_v41, 2  ;;  %v1404_v63 = vrot.slane %v1403_v42, 2  ;;  %v1186_v0 = vadd.f32 %v1185_v38, %v3306_v45  ;;  %v1259_v2 = vadd.f32 %v1258_v40, %v3313_v34 }
 0x208   : > { %v1366_v3 = vadd.f32 %v1365_v58, %v1364_v33  ;;  %v1392_v4 = vadd.f32 %v1391_v59, %v1390_v35  ;;  %v1303_v5 = vmax.f32 %v1184_v60, 0.0  ;;  %v1305_v50 = vmax.f32 %v1257_v61, 0.0 }
 0x209   : > { %v1379_v8 = vadd.f32 %v1378_v62, %v1377_v41  ;;  %v1405_v9 = vadd.f32 %v1404_v63, %v1403_v42  ;;  %v1304_v10 = vmax.f32 %v1186_v0, 0.0  ;;  %v1306_v11 = vmax.f32 %v1259_v2, 0.0  ;;  %v1189_v29 = vpop.f32.mrb[20].mxu1  ;;  %v1262_v13 = vpop.f32.mrb[36].mxu0 }
 0x20a   : > { %v1367_v51 = vrot.slane %v1366_v3, 1  ;;  %v1393_v14 = vrot.slane %v1392_v4, 1  ;;  %v1408_v15 = vadd.f32 %v1303_v5, %v1295_v36  ;;  %v1434_v16 = vadd.f32 %v1305_v50, %v1297_v37  ;;  %v1191_v17 = vpop.f32.mrb[21].mxu1  ;;  %v1264_v54 = vpop.f32.mrb[37].mxu0 }
 0x20b   : > { %v1380_v18 = vrot.slane %v1379_v8, 1  ;;  %v1406_v19 = vrot.slane %v1405_v9, 1  ;;  %v1421_v20 = vadd.f32 %v1304_v10, %v1296_v43  ;;  %v1447_v21 = vadd.f32 %v1306_v11, %v1298_v46  ;;  %v1193_v56 = vpop.f32.mrb[22].mxu1  ;;  %v1266_v22 = vpop.f32.mrb[38].mxu0 }
 0x20c   : > { %v1368_v57 = vadd.f32 %v1367_v51, %v1366_v3  ;;  %v1394_v23 = vadd.f32 %v1393_v14, %v1392_v4  ;;  %v1190_v24 = vadd.f32 %v1189_v29, %v3294_v39  ;;  %v1263_v25 = vadd.f32 %v1262_v13, %v3301_v44  ;;  %v1195_v26 = vpop.f32.mrb[23].mxu1  ;;  %v1268_v27 = vpop.f32.mrb[39].mxu0 }
 0x20d   : > { %v1381_v28 = vadd.f32 %v1380_v18, %v1379_v8  ;;  %v1407_v30 = vadd.f32 %v1406_v19, %v1405_v9  ;;  %v1192_v31 = vadd.f32 %v1191_v17, %v3306_v45  ;;  %v1265_v32 = vadd.f32 %v1264_v54, %v3313_v34 }
 0x20e   : > { %v1311_v33 = vmax.f32 %v1190_v24, 0.0  ;;  %v1313_v35 = vmax.f32 %v1263_v25, 0.0  ;;  %v1194_v36 = vadd.f32 %v1193_v56, %v3294_v39  ;;  %v1267_v37 = vadd.f32 %v1266_v22, %v3301_v44 }
 0x20f   : > { %v1468_v38 = vcombine.low %v1368_v57, %v1381_v28  ;;  %v1469_v40 = vcombine.low %v1394_v23, %v1407_v30  ;;  %v1312_v41 = vmax.f32 %v1192_v31, 0.0  ;;  %v1314_v42 = vmax.f32 %v1265_v32, 0.0 }
 0x210   : > { %v1409_v43 = vadd.f32 %v1408_v15, %v1311_v33  ;;  %v1435_v46 = vadd.f32 %v1434_v16, %v1313_v35  ;;  %v1319_v58 = vmax.f32 %v1194_v36, 0.0  ;;  %v1321_v59 = vmax.f32 %v1267_v37, 0.0 }
 0x211   : > { %v3337_v60 = vrot.slane %v1468_v38, %v3320_v55  ;;  %v3340_v61 = vrot.slane %v1469_v40, %v3320_v55  ;;  %v1422_v62 = vadd.f32 %v1421_v20, %v1312_v41  ;;  %v1448_v63 = vadd.f32 %v1447_v21, %v1314_v42  ;;  %v1199_v0 = vpop.f32.mrb[24].mxu1  ;;  %v1272_v2 = vpop.f32.mrb[40].mxu0 }
 0x212   : > { %v1410_v3 = vadd.f32 %v1409_v43, %v1319_v58  ;;  %v1436_v4 = vadd.f32 %v1435_v46, %v1321_v59  ;;  %v1196_v5 = vadd.f32 %v1195_v26, %v3306_v45  ;;  %v1269_v50 = vadd.f32 %v1268_v27, %v3313_v34  ;;  %v1201_v8 = vpop.f32.mrb[25].mxu1  ;;  %v1274_v9 = vpop.f32.mrb[41].mxu0 }
 0x213   : > { %v1500_v10 = vcombine.low %v3337_v60, %v3340_v61  ;;  %v1200_v11 = vadd.f32 %v1199_v0, %v3294_v39  ;;  %v1273_v29 = vadd.f32 %v1272_v2, %v3301_v44  ;;  %v1202_v13 = vadd.f32 %v1201_v8, %v3306_v45  ;;  %v1203_v51 = vpop.f32.mrb[26].mxu1  ;;  %v1276_v14 = vpop.f32.mrb[42].mxu0  ;;  %v1622_v60 = vld [vmem:[%s3635_s5 + $0x308] sm:$0xff] }
 0x214   : > { %v1320_v15 = vmax.f32 %v1196_v5, 0.0  ;;  %v1322_v16 = vmax.f32 %v1269_v50, 0.0  ;;  %v1275_v17 = vadd.f32 %v1274_v9, %v3313_v34  ;;  %v1204_v54 = vadd.f32 %v1203_v51, %v3294_v39  ;;  %v1205_v18 = vpop.f32.mrb[27].mxu1  ;;  %v1278_v19 = vpop.f32.mrb[43].mxu0 }
 0x215   : > { %v1327_v20 = vmax.f32 %v1200_v11, 0.0  ;;  %v1329_v21 = vmax.f32 %v1273_v29, 0.0  ;;  %v1328_v56 = vmax.f32 %v1202_v13, 0.0  ;;  %v1277_v27 = vadd.f32 %v1276_v14, %v3301_v44 }
 0x216   : > { %v1423_v22 = vadd.f32 %v1422_v62, %v1320_v15  ;;  %v1449_v57 = vadd.f32 %v1448_v63, %v1322_v16  ;;  %v1330_v23 = vmax.f32 %v1275_v17, 0.0  ;;  %v1335_v24 = vmax.f32 %v1204_v54, 0.0 }
 0x217   : > { %v1411_v25 = vadd.f32 %v1410_v3, %v1327_v20  ;;  %v1437_v26 = vadd.f32 %v1436_v4, %v1329_v21  ;;  %v1206_v28 = vadd.f32 %v1205_v18, %v3306_v45  ;;  %v1279_v32 = vadd.f32 %v1278_v19, %v3313_v34 }
 0x218   : > { %v1424_v30 = vadd.f32 %v1423_v22, %v1328_v56  ;;  %v1450_v31 = vadd.f32 %v1449_v57, %v1330_v23  ;;  %v1337_v35 = vmax.f32 %v1277_v27, 0.0 }
 0x219   : > { %v1412_v33 = vadd.f32 %v1411_v25, %v1335_v24  ;;  %v1336_v36 = vmax.f32 %v1206_v28, 0.0  ;;  %v1209_v37 = vpop.f32.mrb[28].mxu1  ;;  %v1282_v38 = vpop.f32.mrb[44].mxu0  ;;  %v1338_v40 = vmax.f32 %v1279_v32, 0.0 }
 0x21a   : > { %v1210_v41 = vadd.f32 %v1209_v37, %v3294_v39  ;;  %v1283_v42 = vadd.f32 %v1282_v38, %v3301_v44  ;;  %v1211_v43 = vpop.f32.mrb[29].mxu1  ;;  %v1284_v46 = vpop.f32.mrb[45].mxu0  ;;  %v1438_v58 = vadd.f32 %v1437_v26, %v1337_v35 }
 0x21b   : > { %v1425_v59 = vadd.f32 %v1424_v30, %v1336_v36  ;;  %v1212_v62 = vadd.f32 %v1211_v43, %v3306_v45  ;;  %v1285_v63 = vadd.f32 %v1284_v46, %v3313_v34  ;;  %v1213_v0 = vpop.f32.mrb[30].mxu1  ;;  %v1286_v2 = vpop.f32.mrb[46].mxu0  ;;  %v1451_v3 = vadd.f32 %v1450_v31, %v1338_v40 }
 0x21c   : > { %v1343_v4 = vmax.f32 %v1210_v41, 0.0  ;;  %v1345_v5 = vmax.f32 %v1283_v42, 0.0  ;;  %v1214_v50 = vadd.f32 %v1213_v0, %v3294_v39  ;;  %v1215_v8 = vpop.f32.mrb[31].mxu1  ;;  %v1288_v9 = vpop.f32.mrb[47].mxu0  ;;  %v1287_v13 = vadd.f32 %v1286_v2, %v3301_v44 }
 0x21d   : > { %v1344_v11 = vmax.f32 %v1212_v62, 0.0  ;;  %v1346_v29 = vmax.f32 %v1285_v63, 0.0  ;;  %v1216_v51 = vadd.f32 %v1215_v8, %v3306_v45  ;;  %v1289_v17 = vadd.f32 %v1288_v9, %v3313_v34  ;;  %v1590_v9 = vld [vmem:[%s3635_s5 + $0x208] sm:$0xff] }
 0x21e   : > { %v1413_v14 = vadd.f32 %v1412_v33, %v1343_v4  ;;  %v1439_v15 = vadd.f32 %v1438_v58, %v1345_v5  ;;  %v1351_v16 = vmax.f32 %v1214_v50, 0.0  ;;  %v1353_v19 = vmax.f32 %v1287_v13, 0.0  ;;  %v1589_v50 = vld [vmem:[%s3635_s5 + $0x200] sm:$0xff]  ;;  %v1608_v13 = vld [vmem:[%s3635_s5 + $0x298] sm:$0xff] }
 0x21f   : > { %v1426_v54 = vadd.f32 %v1425_v59, %v1344_v11  ;;  %v1452_v18 = vadd.f32 %v1451_v3, %v1346_v29  ;;  %v1352_v20 = vmax.f32 %v1216_v51, 0.0  ;;  %v1354_v56 = vmax.f32 %v1289_v17, 0.0  ;;  %v1621_v11 = vld [vmem:[%s3635_s5 + $0x300] sm:$0xff]  ;;  %v1639_v51 = vld [vmem:[%s3635_s5 + $0x390] sm:$0xff] }
 0x220   : > { %v1414_v21 = vadd.f32 %v1413_v14, %v1351_v16  ;;  %v1440_v39 = vadd.f32 %v1439_v15, %v1353_v19  ;;  %v1508_v4 = vrot.slane %v1500_v10, %v3320_v55  ;;  %v2407_v10 = vpack.c.bf16 %v1590_v9, %v1589_v50  ;;  %v1640_v14 = vld [vmem:[%s3635_s5 + $0x398] sm:$0xff] }
 0x221   : > { %v1427_v22 = vadd.f32 %v1426_v54, %v1352_v20  ;;  %v1453_v23 = vadd.f32 %v1452_v18, %v1354_v56  ;;  %v2439_v29 = vpack.c.bf16 %v1622_v60, %v1621_v11  ;;  %v1591_v18 = vld [vmem:[%s3635_s5 + $0x210] sm:$0xff]  ;;  %v2441_v20 = vpack.c.bf16 %v1640_v14, %v1639_v51  ;;  %v1641_v56 = vld [vmem:[%s3635_s5 + $0x3a0] sm:$0xff]  ;;  %v1616_v50 = vld [vmem:[%s3635_s5 + $0x2d8] sm:$0xff] }
 0x222   : > { %v1415_v57 = vrot.slane %v1414_v21, 4  ;;  %v1441_v24 = vrot.slane %v1440_v39, 4  ;;  %v1648_v9 = vld [vmem:[%s3635_s5 + $0x3d8] sm:$0xff]  ;;  %v1631_v51 = vld [vmem:[%s3635_s5 + $0x350] sm:$0xff] }
 0x223   : > { %v1428_v25 = vrot.slane %v1427_v22, 4  ;;  %v1454_v26 = vrot.slane %v1453_v23, 4  ;;  %v1632_v14 = vld [vmem:[%s3635_s5 + $0x358] sm:$0xff] }
 0x224   : > { %v1416_v44 = vadd.f32 %v1415_v57, %v1414_v21  ;;  %v1442_v45 = vadd.f32 %v1441_v24, %v1440_v39  ;;  %v1610_v21 = vld [vmem:[%s3635_s5 + $0x2a8] sm:$0xff] }
 0x225   : > { %v1429_v27 = vadd.f32 %v1428_v25, %v1427_v22  ;;  %v1455_v30 = vadd.f32 %v1454_v26, %v1453_v23  ;;  %v1642_v39 = vld [vmem:[%s3635_s5 + $0x3a8] sm:$0xff]  ;;  %v1593_v25 = vld [vmem:[%s3635_s5 + $0x220] sm:$0xff] }
 0x226   : > { %v1417_v28 = vrot.slane %v1416_v44, 2  ;;  %v1443_v31 = vrot.slane %v1442_v45, 2 }
 0x227   : > { %v1430_v34 = vrot.slane %v1429_v27, 2  ;;  %v1456_v33 = vrot.slane %v1455_v30, 2 }
 0x228   : > { %v1418_v32 = vadd.f32 %v1417_v28, %v1416_v44  ;;  %v1444_v35 = vadd.f32 %v1443_v31, %v1442_v45  ;;  %v1594_v44 = vld [vmem:[%s3635_s5 + $0x228] sm:$0xff]  ;;  %v1612_v28 = vld [vmem:[%s3635_s5 + $0x2b8] sm:$0xff] }
 0x229   : > { %v1431_v36 = vadd.f32 %v1430_v34, %v1429_v27  ;;  %v1457_v38 = vadd.f32 %v1456_v33, %v1455_v30  ;;  %v1626_v45 = vld [vmem:[%s3635_s5 + $0x328] sm:$0xff]  ;;  %v1611_v27 = vld [vmem:[%s3635_s5 + $0x2b0] sm:$0xff]  ;;  %v1644_v31 = vld [vmem:[%s3635_s5 + $0x3b8] sm:$0xff]  ;;  %v2415_v34 = vpack.c.bf16 %v1594_v44, %v1593_v25 }
 0x22a   : > { %v1419_v37 = vrot.slane %v1418_v32, 1  ;;  %v1445_v40 = vrot.slane %v1444_v35, 1  ;;  %v1643_v30 = vld [vmem:[%s3635_s5 + $0x3b0] sm:$0xff] }
 0x22b   : > { %v1432_v41 = vrot.slane %v1431_v36, 1  ;;  %v1458_v43 = vrot.slane %v1457_v38, 1  ;;  %v1595_v33 = vld [vmem:[%s3635_s5 + $0x230] sm:$0xff] }
 0x22c   : > { %v1420_v42 = vadd.f32 %v1419_v37, %v1418_v32  ;;  %v1446_v46 = vadd.f32 %v1445_v40, %v1444_v35  ;;  %v1596_v35 = vld [vmem:[%s3635_s5 + $0x238] sm:$0xff]  ;;  %v2449_v37 = vpack.c.bf16 %v1644_v31, %v1643_v30  ;;  %v1603_v25 = vld [vmem:[%s3635_s5 + $0x270] sm:$0xff] }
 0x22d   : > { %v1433_v58 = vadd.f32 %v1432_v41, %v1431_v36  ;;  %v1459_v59 = vadd.f32 %v1458_v43, %v1457_v38  ;;  %v2417_v36 = vpack.c.bf16 %v1612_v28, %v1611_v27  ;;  %v1627_v38 = vld [vmem:[%s3635_s5 + $0x330] sm:$0xff]  ;;  %v1628_v40 = vld [vmem:[%s3635_s5 + $0x338] sm:$0xff]  ;;  %v1613_v41 = vld [vmem:[%s3635_s5 + $0x2c0] sm:$0xff] }
 0x22e   : > { %v1645_v43 = vld [vmem:[%s3635_s5 + $0x3c0] sm:$0xff] }
 0x22f   : > { %v1470_v62 = vcombine.low %v1420_v42, %v1433_v58  ;;  %v1471_v63 = vcombine.low %v1446_v46, %v1459_v59  ;;  %v1614_v42 = vld [vmem:[%s3635_s5 + $0x2c8] sm:$0xff]  ;;  %v2419_v58 = vpack.c.bf16 %v1596_v35, %v1595_v33  ;;  %v2451_v59 = vpack.c.bf16 %v1628_v40, %v1627_v38  ;;  %v1653_v33 = vld [vmem:[%s3636_s6] sm:$0x1] }
 0x230   : > { %v1646_v46 = vld [vmem:[%s3635_s5 + $0x3c8] sm:$0xff] }
 0x231   : > { %v1492_v0 = vrot.slane %v1470_v62, %v3320_v55  ;;  %v1499_v2 = vrot.slane %v1471_v63, %v3320_v55  ;;  %v1597_v62 = vld [vmem:[%s3635_s5 + $0x240] sm:$0xff]  ;;  %v1598_v63 = vld [vmem:[%s3635_s5 + $0x248] sm:$0xff] }
 0x232   : > { %v2423_v11 = vpack.c.bf16 %v1598_v63, %v1597_v62 }
 0x233   : > { %v1501_v3 = vcombine.low %v1492_v0, %v1499_v2  ;;  %v2421_v0 = vpack.c.bf16 %v1614_v42, %v1613_v41  ;;  %v2453_v2 = vpack.c.bf16 %v1646_v46, %v1645_v43 }
 0x235   : > { %v1515_v5 = vrot.slane %v1501_v3, %v3320_v55  ;;  %v1607_v55 = vld [vmem:[%s3635_s5 + $0x290] sm:$0xff]  ;;  %v1629_v3 = vld [vmem:[%s3635_s5 + $0x340] sm:$0xff] }
 0x236   : > { %v2409_v19 = vpack.c.bf16 %v1608_v13, %v1607_v55  ;;  %v1599_v55 = vld [vmem:[%s3635_s5 + $0x250] sm:$0xff] }
 0x237   : > { %v1516_v8 = vcombine.low %v1508_v4, %v1515_v5  ;;  %v1630_v4 = vld [vmem:[%s3635_s5 + $0x348] sm:$0xff]  ;;  %v1615_v5 = vld [vmem:[%s3635_s5 + $0x2d0] sm:$0xff] }
 0x238   : > { %v2455_v60 = vpack.c.bf16 %v1630_v4, %v1629_v3 }
 0x239   : > { %v3381_v61 = vmul.f32 0.015625, %v1516_v8  ;;  %v1647_v8 = vld [vmem:[%s3635_s5 + $0x3d0] sm:$0xff] }
 0x23a   : > { %v2457_v13 = vpack.c.bf16 %v1648_v9, %v1647_v8 }
 0x23b   : > { %v1662_v15 = vrot.slane %v3381_v61, %v645_v52  ;;  %v1670_v16 = vrot.slane %v3381_v61, %v653_v53  ;;  %v1658_v17 = vrot.slane %v3381_v61, %v641_v48  ;;  %v1666_v54 = vrot.slane %v3381_v61, %v649_v49  ;;  %v1592_v52 = vld [vmem:[%s3635_s5 + $0x218] sm:$0xff]  ;;  %v1623_v53 = vld [vmem:[%s3635_s5 + $0x310] sm:$0xff]  ;;  %v1609_v49 = vld [vmem:[%s3635_s5 + $0x2a0] sm:$0xff] }
 0x23c   : > { %v1624_v48 = vld [vmem:[%s3635_s5 + $0x318] sm:$0xff]  ;;  %v1678_v22 = vrot.slane %v3381_v61, %v661_v7  ;;  %v1686_v57 = vrot.slane %v3381_v61, %v669_v12  ;;  %v2411_v23 = vpack.c.bf16 %v1592_v52, %v1591_v18  ;;  %v2413_v26 = vpack.c.bf16 %v1610_v21, %v1609_v49  ;;  %v1625_v12 = vld [vmem:[%s3635_s5 + $0x320] sm:$0xff]  ;;  %v1634_v21 = vld [vmem:[%s3635_s5 + $0x368] sm:$0xff] }
 0x23d   : > { %1759 = vmatprep.mubr.f32.mxu1 %v1662_v15  ;;  %1829 = vmatprep.mubr.f32.mxu0 %v1670_v16  ;;  %v2443_v24 = vpack.c.bf16 %v1624_v48, %v1623_v53  ;;  %v2445_v7 = vpack.c.bf16 %v1642_v39, %v1641_v56  ;;  %v2447_v32 = vpack.c.bf16 %v1626_v45, %v1625_v12  ;;  %v1617_v15 = vld [vmem:[%s3635_s5 + $0x2e0] sm:$0xff]  ;;  %v1618_v16 = vld [vmem:[%s3635_s5 + $0x2e8] sm:$0xff]  ;;  %v1619_v56 = vld [vmem:[%s3635_s5 + $0x2f0] sm:$0xff] }
 0x23e   : > { %1760 = vmatmul.mubr.f32.vlgmr.msra.gmra.mrb[32].mxu1 %v1658_v17  ;;  %1830 = vmatmul.mubr.f32.vlgmr.msra.gmra.mrb[48].mxu0 %v1666_v54  ;;  %v1649_v17 = vld [vmem:[%s3635_s5 + $0x3e0] sm:$0xff]  ;;  %v1650_v54 = vld [vmem:[%s3635_s5 + $0x3e8] sm:$0xff]  ;;  %v2459_v52 = vpack.c.bf16 %v1632_v14, %v1631_v51  ;;  %v2429_v49 = vpack.c.bf16 %v1618_v16, %v1617_v15  ;;  %v1620_v39 = vld [vmem:[%s3635_s5 + $0x2f8] sm:$0xff]  ;;  %v1674_v30 = vrot.slane %v3381_v61, %v657_v1 }
 0x23f   : > { %2408 = vmatpush3.bf16.msra.mxu1 %v2407_v10  ;;  %2440 = vmatpush3.bf16.msra.mxu0 %v2439_v29  ;;  %v1600_v10 = vld [vmem:[%s3635_s5 + $0x258] sm:$0xff]  ;;  %v2425_v29 = vpack.c.bf16 %v1616_v50, %v1615_v5  ;;  %v1601_v53 = vld [vmem:[%s3635_s5 + $0x260] sm:$0xff]  ;;  %v1602_v48 = vld [vmem:[%s3635_s5 + $0x268] sm:$0xff]  ;;  %v2433_v44 = vpack.c.bf16 %v1620_v39, %v1619_v56  ;;  %v1682_v31 = vrot.slane %v3381_v61, %v665_v6 }
 0x240   : > { %1899 = vmatprep.mubr.f32.mxu1 %v1678_v22  ;;  %1969 = vmatprep.mubr.f32.mxu0 %v1686_v57  ;;  %v2427_v18 = vpack.c.bf16 %v1600_v10, %v1599_v55  ;;  %v1651_v22 = vld [vmem:[%s3635_s5 + $0x3f0] sm:$0xff]  ;;  %v1652_v57 = vld [vmem:[%s3635_s5 + $0x3f8] sm:$0xff] }
 0x241   : > { %2410 = vmatprep.subr.bf16.mxu1 %v2409_v19  ;;  %2442 = vmatprep.subr.bf16.mxu0 %v2441_v20  ;;  %v2461_v19 = vpack.c.bf16 %v1650_v54, %v1649_v17  ;;  %v1633_v20 = vld [vmem:[%s3635_s5 + $0x360] sm:$0xff]  ;;  %v1635_v12 = vld [vmem:[%s3635_s5 + $0x370] sm:$0xff]  ;;  %v1636_v45 = vld [vmem:[%s3635_s5 + $0x378] sm:$0xff] }
 0x242   : > { %v2467_v28 = vpack.c.bf16 %v1636_v45, %v1635_v12 }
 0x243   : > { %2412 = vmatpush3.bf16.msra.mxu1 %v2411_v23  ;;  %2444 = vmatpush3.bf16.msra.mxu0 %v2443_v24  ;;  %v2431_v23 = vpack.c.bf16 %v1602_v48, %v1601_v53  ;;  %v2463_v24 = vpack.c.bf16 %v1634_v21, %v1633_v20 }
 0x244   : > { %2414 = vmatprep.subr.bf16.mxu1 %v2413_v26  ;;  %2446 = vmatprep.subr.bf16.mxu0 %v2445_v7  ;;  %v2465_v26 = vpack.c.bf16 %v1652_v57, %v1651_v22  ;;  %v1604_v7 = vld [vmem:[%s3635_s5 + $0x278] sm:$0xff] }
 0x245   : > { %v2435_v27 = vpack.c.bf16 %v1604_v7, %v1603_v25 }
 0x247   : > { %2416 = vmatpush3.bf16.msra.mxu1 %v2415_v34  ;;  %2448 = vmatpush3.bf16.msra.mxu0 %v2447_v32 }
 0x248   : > { %2418 = vmatprep.subr.bf16.mxu1 %v2417_v36  ;;  %2450 = vmatprep.subr.bf16.mxu0 %v2449_v37 }
 0x24b   : > { %2420 = vmatpush3.bf16.msra.mxu1 %v2419_v58  ;;  %2452 = vmatpush3.bf16.msra.mxu0 %v2451_v59 }
 0x24c   : > { %2422 = vmatprep.subr.bf16.mxu1 %v2421_v0  ;;  %2454 = vmatprep.subr.bf16.mxu0 %v2453_v2 }
 0x24f   : > { %2424 = vmatpush3.bf16.msra.mxu1 %v2423_v11  ;;  %2456 = vmatpush3.bf16.msra.mxu0 %v2455_v60 }
 0x250   : > { %2426 = vmatprep.subr.bf16.mxu1 %v2425_v29  ;;  %2458 = vmatprep.subr.bf16.mxu0 %v2457_v13 }
 0x253   : > { %2428 = vmatpush3.bf16.msra.mxu1 %v2427_v18  ;;  %2460 = vmatpush3.bf16.msra.mxu0 %v2459_v52 }
 0x254   : > { %2430 = vmatprep.subr.bf16.mxu1 %v2429_v49  ;;  %2462 = vmatprep.subr.bf16.mxu0 %v2461_v19 }
 0x257   : > { %2432 = vmatpush3.bf16.msra.mxu1 %v2431_v23  ;;  %2464 = vmatpush3.bf16.msra.mxu0 %v2463_v24 }
 0x258   : > { %2434 = vmatprep.subr.bf16.mxu1 %v2433_v44  ;;  %2466 = vmatprep.subr.bf16.mxu0 %v2465_v26 }
 0x25b   : > { %2436 = vmatpush3.bf16.msra.mxu1 %v2435_v27  ;;  %2468 = vmatpush3.bf16.msra.mxu0 %v2467_v28 }
 0x25e   : > { %1900 = vmatmul.mubr.f32.vlgmr.msra.gmra.mrb[34].mxu1 %v1674_v30  ;;  %1970 = vmatmul.mubr.f32.vlgmr.msra.gmra.mrb[50].mxu0 %v1682_v31 }
 0x311   : > { %v2233_v34 = vpop.f32.mrb[32].mxu1  ;;  %v2268_v32 = vpop.f32.mrb[48].mxu0 }
 0x312   : > { %v2234_v35 = vpop.f32.mrb[33].mxu1  ;;  %v2269_v36 = vpop.f32.mrb[49].mxu0 }
 0x313   : > { %v2235_v37 = vadd.f32 %v2234_v35, %v2233_v34  ;;  %v2270_v38 = vadd.f32 %v2269_v36, %v2268_v32 }
 0x315   : > { %v1762_v40 = vadd.f32 %v2235_v37, %v1653_v33 }
 0x317   : > { %v1832_v41 = vadd.f32 %v2270_v38, %v1762_v40 }
 0x331   : > { %v2303_v1 = vpop.f32.mrb[34].mxu1  ;;  %v2338_v47 = vpop.f32.mrb[50].mxu0 }
 0x332   : > { %v2304_v6 = vpop.f32.mrb[35].mxu1  ;;  %v2339_v61 = vpop.f32.mrb[51].mxu0 }
 0x333   : > { %v2305_v42 = vadd.f32 %v2304_v6, %v2303_v1  ;;  %v2340_v43 = vadd.f32 %v2339_v61, %v2338_v47 }
 0x335   : > { %v1902_v46 = vadd.f32 %v2305_v42, %v1832_v41 }
 0x337   : > { %v1972_v58 = vadd.f32 %v2340_v43, %v1902_v46 }
 0x339   : > { %1975 = vst [vmem:[%s295_s20] sm:$0x1] %v1972_v58 }
 0x33a   : > { %2567 = shalt.err (!%p2564_p5)
}
 0x33b   : > { %s2568_s12 = scalar_lea.hbm %s3583_s23, 16  ;;  %s2572_s19 = scalar_lea.hbm %s3637_s7, 32 }
 0x33c   : > { %p2569_p6 = scmp.ne.s32.totalorder %s3583_s23, %s2568_s12  ;;  %p2573_p10 = scmp.lt.u32.totalorder %s3583_s23, %s3637_s7 }
 0x33d   : > { %p2574_p11 = scmp.lt.u32.totalorder %s2572_s19, %s2568_s12  ;;  %p2576_p13 = scmp.lt.u32.totalorder %s2568_s12, %s3583_s23 }
 0x33e   : > { %p2570_p7 = pnand %p2569_p6, %p2717_p4 }
 0x33f   : > { %p2575_p12 = por %p2574_p11, %p2573_p10 }
 0x340   : > { %p2571_p9 = pneg %p2570_p7 }
 0x341   : > { %p2577_p0 = por %p2576_p13, %p2575_p12 }
 0x343   : > { %p2578_p1 = pnand %p2577_p0, %p2571_p9 }
 0x345   : > { %2581 = shalt.err (!%p2578_p1)
}
 0x346   : > { %2469 = dma.vmem_to_hbm [thread:$0]  (%p2717_p4), %s3585_s21, 16, %s3583_s23, %s1977_s8  }
 0x347 PF: > { %p2475_p2 = scmp.ge.s32.totalorder %s2632_s29, 2  ;;  %s2001_s22 = sand.u32 1, %s2612_s24  }
 0x348   : > { %s2002_s10 = scalar_lea.sflag [#allocation4], %s2001_s22 }
 0x349   : > { %p2472_p3 = pnand %p2475_p2, %p2724_p8 }
 0x34b   : > { %2607 = dma.done.wait (!%p2472_p3), %s2002_s10, 16  }
 0x34c   : > { %2609 = vsyncadd (!%p2472_p3), %s2002_s10, 4294967280  ;;  %s20_s29 = sadd.s32 1, %s2632_s29   ;;  %s3640_s24 = smov %s2616_s25 }
 0x34d   : > { %p17_p5 = scmp.ge.s32.totalorder %s20_s29, 4   ;;  %s3641_s25 = smov %s2620_s26 }
 0x34e   : > { %s3642_s26 = smov %s2730_s14  ;;  %s3643_s27 = smov %s2628_s28 }
 0x34f   : > { %s3644_s28 = smov %s3646_s9  ;;  %19 = sbr.rel (!%p17_p5) target bundleno = 4 (0x4), region = 91 }
 0x356   :  { %2006 = vsyncpa [#allocation4], 1 }
 0x357   :  { %2008 = vsyncpa [#allocation4 + $0x1], 1 }

</bundles_post_ra>
